<compile_context>
chip_gen: v6e
topology: v6e:2x2x1
jax: 0.10.0
libtpu: 0.0.40
codegen_flags: <defaults>
</compile_context>

<pallas_src>
import jax
import jax.numpy as jnp
from jax import lax
from jax.experimental import pallas as pl
from jax.experimental.pallas import tpu as pltpu


def _round_up(x, m):
    return (x + m - 1) // m * m


def _pad_axis(x, axis, target):
    pad = [(0, 0)] * x.ndim
    pad[axis] = (0, target - x.shape[axis])
    return jnp.pad(x, pad)


def _prep_lstm_weights(w_ih, w_hh, b_ih, b_hh, H, Hp):
    """Permute PyTorch gate order (i,f,g,o) -> (i,f,o,g), transpose, and pad each gate
    block's hidden dim to Hp (a multiple of 128 lanes).

    Returns:
      wih_p : (E, 4Hp)   for the hoisted input projection (done in XLA)
      whh_p : (Hp, 4Hp)  recurrent weights used inside the kernel
      b_p   : (1, 4Hp)   fused bias (b_ih + b_hh), folded into the input projection
    """
    order = (0, 1, 3, 2)  # i, f, o, g
    wih_blocks, whh_blocks, b_blocks = [], [], []
    for g in order:
        sl = slice(g * H, (g + 1) * H)
        wih_blocks.append(_pad_axis(w_ih[sl].T.astype(jnp.float32), 1, Hp))          # (E, Hp)
        wh = _pad_axis(w_hh[sl].T.astype(jnp.float32), 1, Hp)                         # (H, Hp)
        whh_blocks.append(_pad_axis(wh, 0, Hp))                                       # (Hp, Hp)
        b_blocks.append(_pad_axis((b_ih[sl] + b_hh[sl]).astype(jnp.float32), 0, Hp))  # (Hp,)
    wih_p = jnp.concatenate(wih_blocks, axis=1)
    whh_p = jnp.concatenate(whh_blocks, axis=1)
    b_p = jnp.concatenate(b_blocks).reshape(1, 4 * Hp)
    return wih_p, whh_p, b_p


def lstm_recurrence_kernel(maxlen_ref, gx_ref, lens_ref, whh_ref, h_out_ref, h_scr, c_scr):
    """Streams the time axis (grid axis 1) with persistent h/c state in VMEM scratch.

    maxlen_ref : (1,)                 int32 scalar-prefetch (SMEM): max true length
    gx_ref     : (T_CHUNK, BT, 4Hp)   f32  precomputed x@W_ih + b for this time chunk
    lens_ref   : (BT, 1)              int32 true sequence lengths (padded rows = 0)
    whh_ref    : (Hp, 4Hp)            f32  recurrent weights (gate order i,f,o,g)
    h_out_ref  : (BT, Hp)             f32  final hidden state (written on last chunk)
    h_scr/c_scr: (BT, Hp)             f32  persistent LSTM state
    """
    t_idx = pl.program_id(1)
    t_chunk = gx_ref.shape[0]
    Hp = whh_ref.shape[0]

    @pl.when(t_idx == 0)
    def _init():
        h_scr[...] = jnp.zeros_like(h_scr)
        c_scr[...] = jnp.zeros_like(c_scr)

    chunk_start = t_idx * t_chunk

    # Skip whole chunks that lie entirely beyond the longest sequence.
    @pl.when(chunk_start < maxlen_ref[0])
    def _run_chunk():
        whh = whh_ref[...]
        lens = lens_ref[...]  # (BT, 1) int32

        def step(t, carry):
            h, c = carry
            # Only the recurrent matmul sits on the sequential critical path.
            gates = gx_ref[t] + jnp.dot(h, whh, preferred_element_type=jnp.float32)
            # Gates were permuted to (i, f, o, g): one wide sigmoid slab + one tanh slab.
            sig = jax.nn.sigmoid(gates[:, : 3 * Hp])
            i_g = sig[:, 0 * Hp:1 * Hp]
            f_g = sig[:, 1 * Hp:2 * Hp]
            o_g = sig[:, 2 * Hp:3 * Hp]
            g_g = jnp.tanh(gates[:, 3 * Hp:])
            c_new = f_g * c + i_g * g_g
            h_new = o_g * jnp.tanh(c_new)
            # PackedSequence semantics: freeze state past the true length (FMA-form mask).
            m = (chunk_start + t < lens).astype(jnp.float32)  # (BT, 1)
            return h + m * (h_new - h), c + m * (c_new - c)

        h_f, c_f = lax.fori_loop(0, t_chunk, step, (h_scr[...], c_scr[...]), unroll=True)
        h_scr[...] = h_f
        c_scr[...] = c_f

    @pl.when(t_idx == pl.num_programs(1) - 1)
    def _finalize():
        h_out_ref[...] = h_scr[...]


def malstm_forward(qa, qb, emb_table, w_ih, w_hh, b_ih, b_hh, w_cls, b_cls, pad_idx=1,
                   *, t_chunk=4, batch_tile=None):
    """Embedding lookup, hoisted input projection, Pallas recurrence, tiny XLA epilogue."""
    B, T = qa.shape
    E = emb_table.shape[1]
    H = w_hh.shape[1]

    Hp = _round_up(H, 128)          # lane-dense hidden width
    Bp = _round_up(B, 8)            # per-question batch rows -> sublane multiple
    B2p = 2 * Bp                    # qa rows [0:Bp), qb rows [Bp:2Bp)
    t_chunk = max(1, min(t_chunk, T))
    Tp = _round_up(T, t_chunk)

    # ---- Embedding lookup + true lengths (plain-JAX glue, matches pack_padded_sequence
    #      semantics for end-padded inputs). ----
    ea = jnp.take(emb_table, qa, axis=0).astype(jnp.float32)  # (B, T, E)
    eb = jnp.take(emb_table, qb, axis=0).astype(jnp.float32)  # (B, T, E)
    len_a = jnp.sum((qa != pad_idx).astype(jnp.int32), axis=1)
    len_b = jnp.sum((qb != pad_idx).astype(jnp.int32), axis=1)

    x = jnp.zeros((T, B2p, E), jnp.float32)
    x = x.at[:, :B, :].set(jnp.transpose(ea, (1, 0, 2)))
    x = x.at[:, Bp:Bp + B, :].set(jnp.transpose(eb, (1, 0, 2)))

    lens = jnp.zeros((B2p, 1), jnp.int32)
    lens = lens.at[:B, 0].set(len_a)
    lens = lens.at[Bp:Bp + B, 0].set(len_b)
    maxlen = jnp.max(lens).reshape(1).astype(jnp.int32)

    # ---- Weight prep: gate permutation (i,f,o,g) + per-gate padding to Hp lanes. ----
    wih_p, whh_p, b_p = _prep_lstm_weights(w_ih, w_hh, b_ih, b_hh, H, Hp)

    # ---- Hoisted input projection: one big MXU-friendly matmul, off the recurrent path. ----
    gates_x = jnp.einsum('tbe,eg->tbg', x, wih_p) + b_p           # (T, B2p, 4Hp)
    gates_x = _pad_axis(gates_x, 0, Tp)                           # pad T to chunk multiple

    # ---- Grid: (batch tiles [parallel], time chunks [arbitrary]). ----
    if batch_tile is None:
        batch_tile = B2p if B2p <= 256 else 256
    assert B2p % batch_tile == 0
    nb = B2p // batch_tile
    nt = Tp // t_chunk

    h_final = pl.pallas_call(
        lstm_recurrence_kernel,
        out_shape=jax.ShapeDtypeStruct((B2p, Hp), jnp.float32),
        grid_spec=pltpu.PrefetchScalarGridSpec(
            num_scalar_prefetch=1,
            grid=(nb, nt),
            in_specs=[
                pl.BlockSpec((t_chunk, batch_tile, 4 * Hp), lambda b, t, ml: (t, b, 0)),
                pl.BlockSpec((batch_tile, 1), lambda b, t, ml: (b, 0)),
                pl.BlockSpec((Hp, 4 * Hp), lambda b, t, ml: (0, 0)),
            ],
            out_specs=pl.BlockSpec((batch_tile, Hp), lambda b, t, ml: (b, 0)),
            scratch_shapes=[
                pltpu.VMEM((batch_tile, Hp), jnp.float32),  # h
                pltpu.VMEM((batch_tile, Hp), jnp.float32),  # c
            ],
        ),
        compiler_params=pltpu.CompilerParams(
            dimension_semantics=("parallel", "arbitrary"),
        ),
    )(maxlen, gates_x, lens, whh_p)

    # ---- Tiny epilogue in plain XLA (avoids masked (B, 2) stores inside the kernel). ----
    ha = h_final[:B, :H]
    hb = h_final[Bp:Bp + B, :H]
    fmap = jnp.exp(-jnp.abs(ha - hb))
    score = fmap @ w_cls.T.astype(jnp.float32) + b_cls.astype(jnp.float32)
    return score


def malstm_reference(qa, qb, emb_table, w_ih, w_hh, b_ih, b_hh, w_cls, b_cls, pad_idx=1):
    """Pure-JAX reference of the same forward pass (for correctness checking)."""
    H = w_hh.shape[1]

    def encode(tokens):
        B, T = tokens.shape
        emb = jnp.take(emb_table, tokens, axis=0)  # (B, T, E)
        lens = jnp.sum((tokens != pad_idx).astype(jnp.int32), axis=1)  # (B,)
        h = jnp.zeros((B, H), jnp.float32)
        c = jnp.zeros((B, H), jnp.float32)

        def step(carry, t):
            h, c = carry
            x_t = emb[:, t, :]
            gates = x_t @ w_ih.T + h @ w_hh.T + b_ih + b_hh
            i_g = jax.nn.sigmoid(gates[:, 0:H])
            f_g = jax.nn.sigmoid(gates[:, H:2 * H])
            g_g = jnp.tanh(gates[:, 2 * H:3 * H])
            o_g = jax.nn.sigmoid(gates[:, 3 * H:4 * H])
            c_new = f_g * c + i_g * g_g
            h_new = o_g * jnp.tanh(c_new)
            active = (t < lens)[:, None]
            return (jnp.where(active, h_new, h), jnp.where(active, c_new, c)), None

        (h, _), _ = lax.scan(step, (h, c), jnp.arange(emb.shape[1]))
        return h

    ha = encode(qa)
    hb = encode(qb)
    fmap = jnp.exp(-jnp.abs(ha - hb))
    return fmap @ w_cls.T + b_cls


if __name__ == "__main__":
    # Small, forward-consistent shapes.
    B, T, V, E, H, C = 2, 8, 50, 32, 32, 2
    PAD = 1

    key = jax.random.PRNGKey(0)
    k_emb, k_ih, k_hh, k_bi, k_bh, k_wc, k_bc, k_qa, k_qb = jax.random.split(key, 9)

    # Deterministic parameter init (synthetic; shapes match nn.Embedding/nn.LSTM/nn.Linear).
    emb_table = 0.1 * jax.random.normal(k_emb, (V, E), jnp.float32)
    emb_table = emb_table.at[PAD].set(0.0)          # padding_idx=1 row is zero
    scale = 1.0 / jnp.sqrt(H)
    w_ih = jax.random.uniform(k_ih, (4 * H, E), jnp.float32, -scale, scale)
    w_hh = jax.random.uniform(k_hh, (4 * H, H), jnp.float32, -scale, scale)
    b_ih = jax.random.uniform(k_bi, (4 * H,), jnp.float32, -scale, scale)
    b_hh = jax.random.uniform(k_bh, (4 * H,), jnp.float32, -scale, scale)
    w_cls = jax.random.uniform(k_wc, (C, H), jnp.float32, -scale, scale)
    b_cls = jax.random.uniform(k_bc, (C,), jnp.float32, -scale, scale)

    # Token inputs with end-padding (pad id = 1), ids in [2, V).
    qa = jax.random.randint(k_qa, (B, T), 2, V, jnp.int32)
    qb = jax.random.randint(k_qb, (B, T), 2, V, jnp.int32)
    qa = qa.at[0, 6:].set(PAD)   # example 0 of qa has length 6
    qb = qb.at[1, 5:].set(PAD)   # example 1 of qb has length 5

    score = malstm_forward(qa, qb, emb_table, w_ih, w_hh, b_ih, b_hh, w_cls, b_cls, PAD)
    score = jax.block_until_ready(score)

    ref = malstm_reference(qa, qb, emb_table, w_ih, w_hh, b_ih, b_hh, w_cls, b_cls, PAD)
    assert score.shape == (B, C)
    assert jnp.allclose(score, ref, atol=1e-4, rtol=1e-4), (score, ref)

    print("KERNEL_OK")
</pallas_src>

<mosaic_0001>
module attributes {stable_mosaic.version = 11 : i64} {
  func.func @lstm_recurrence_kernel(%arg0: i32, %arg1: i32, %arg2: memref<1xi32, #tpu.memory_space<smem>>, %arg3: memref<4x16x512xf32, #tpu.memory_space<vmem>>, %arg4: memref<16x1xi32, #tpu.memory_space<vmem>>, %arg5: memref<128x512xf32, #tpu.memory_space<vmem>>, %arg6: memref<16x128xf32, #tpu.memory_space<vmem>>, %arg7: memref<16x128xf32, #tpu.memory_space<vmem>>, %arg8: memref<16x128xf32, #tpu.memory_space<vmem>>) attributes {dimension_semantics = [#tpu.dimension_semantics<parallel>, #tpu.dimension_semantics<arbitrary>], iteration_bounds = array<i64: 1, 2>, scalar_prefetch = 1 : i64, scratch_operands = 2 : i64, tpu.core_type = #tpu.core_type<tc>, window_params = [{transform_indices = @transform_0, window_bounds = array<i64: 4, 16, 512>}, {transform_indices = @transform_1, window_bounds = array<i64: 16, 1>}, {pipeline_mode = #tpu.pipeline_mode<synchronous>, transform_indices = @transform_2, window_bounds = array<i64: 128, 512>}, {transform_indices = @transform_3, window_bounds = array<i64: 16, 128>}]} {
    %c0_i32 = arith.constant 0 : i32
    %0 = arith.cmpi eq, %arg1, %c0_i32 : i32
    %1 = arith.extui %0 : i1 to i32
    %c0_i32_0 = arith.constant 0 : i32
    %2 = arith.cmpi ne, %1, %c0_i32_0 : i32
    scf.if %2 {
      %cst = arith.constant 0.000000e+00 : f32
      %11 = vector.broadcast %cst : f32 to vector<16x128xf32>
      %c0_3 = arith.constant 0 : index
      %c0_4 = arith.constant 0 : index
      %12 = vector.load %arg7[%c0_3, %c0_4] : memref<16x128xf32, #tpu.memory_space<vmem>>, vector<16x128xf32>
      tpu.vector_store %arg7[%c0_3, %c0_4], %11 {strides = array<i32>} : memref<16x128xf32, #tpu.memory_space<vmem>>, vector<16x128xf32>,
      %cst_5 = arith.constant 0.000000e+00 : f32
      %13 = vector.broadcast %cst_5 : f32 to vector<16x128xf32>
      %c0_6 = arith.constant 0 : index
      %c0_7 = arith.constant 0 : index
      %14 = vector.load %arg8[%c0_6, %c0_7] : memref<16x128xf32, #tpu.memory_space<vmem>>, vector<16x128xf32>
      tpu.vector_store %arg8[%c0_6, %c0_7], %13 {strides = array<i32>} : memref<16x128xf32, #tpu.memory_space<vmem>>, vector<16x128xf32>,
    } else {
    }
    %c4_i32 = arith.constant 4 : i32
    %3 = arith.muli %arg1, %c4_i32 : i32
    %c0 = arith.constant 0 : index
    %4 = memref.load %arg2[%c0] : memref<1xi32, #tpu.memory_space<smem>>
    %5 = arith.cmpi slt, %3, %4 : i32
    %6 = arith.extui %5 : i1 to i32
    %c0_i32_1 = arith.constant 0 : i32
    %7 = arith.cmpi ne, %6, %c0_i32_1 : i32
    scf.if %7 {
      %c0_3 = arith.constant 0 : index
      %c0_4 = arith.constant 0 : index
      %11 = vector.load %arg5[%c0_3, %c0_4] : memref<128x512xf32, #tpu.memory_space<vmem>>, vector<128x512xf32>
      %c0_5 = arith.constant 0 : index
      %c0_6 = arith.constant 0 : index
      %12 = vector.load %arg4[%c0_5, %c0_6] : memref<16x1xi32, #tpu.memory_space<vmem>>, vector<16x1xi32>
      %c0_7 = arith.constant 0 : index
      %c0_8 = arith.constant 0 : index
      %13 = vector.load %arg7[%c0_7, %c0_8] : memref<16x128xf32, #tpu.memory_space<vmem>>, vector<16x128xf32>
      %c0_9 = arith.constant 0 : index
      %c0_10 = arith.constant 0 : index
      %14 = vector.load %arg8[%c0_9, %c0_10] : memref<16x128xf32, #tpu.memory_space<vmem>>, vector<16x128xf32>
      %c0_i32_11 = arith.constant 0 : i32
      %15 = arith.index_cast %c0_i32_11 : i32 to index
      %c0_12 = arith.constant 0 : index
      %c0_13 = arith.constant 0 : index
      %16 = vector.load %arg3[%15, %c0_12, %c0_13] : memref<4x16x512xf32, #tpu.memory_space<vmem>>, vector<1x16x512xf32>
      %17 = vector.shape_cast %16 : vector<1x16x512xf32> to vector<16x512xf32>
      %cst = arith.constant dense<0.000000e+00> : vector<16x512xf32>
      %18 = tpu.matmul %13, %11, %cst {dimension_numbers = #tpu.dot_dimension_numbers<[1], [0], [0], [1], [0, 0, 1, 1], [], []>} : vector<16x128xf32>, vector<128x512xf32>, vector<16x512xf32> -> vector<16x512xf32>
      %19 = arith.addf %17, %18 : vector<16x512xf32>
      %20 = vector.extract_strided_slice %19 {offsets = [0, 0], sizes = [16, 384], strides = [1, 1]} : vector<16x512xf32> to vector<16x384xf32>
      %21 = arith.negf %20 : vector<16x384xf32>
      %22 = math.exp %21 : vector<16x384xf32>
      %cst_14 = arith.constant 1.000000e+00 : f32
      %23 = vector.broadcast %cst_14 : f32 to vector<16x384xf32>
      %24 = arith.addf %23, %22 : vector<16x384xf32>
      %25 = arith.divf %23, %24 : vector<16x384xf32>
      %26 = vector.extract_strided_slice %25 {offsets = [0, 0], sizes = [16, 128], strides = [1, 1]} : vector<16x384xf32> to vector<16x128xf32>
      %27 = vector.extract_strided_slice %25 {offsets = [0, 128], sizes = [16, 128], strides = [1, 1]} : vector<16x384xf32> to vector<16x128xf32>
      %28 = vector.extract_strided_slice %25 {offsets = [0, 256], sizes = [16, 128], strides = [1, 1]} : vector<16x384xf32> to vector<16x128xf32>
      %29 = vector.extract_strided_slice %19 {offsets = [0, 384], sizes = [16, 128], strides = [1, 1]} : vector<16x512xf32> to vector<16x128xf32>
      %30 = math.tanh %29 : vector<16x128xf32>
      %31 = arith.mulf %27, %14 : vector<16x128xf32>
      %32 = arith.mulf %26, %30 : vector<16x128xf32>
      %33 = arith.addf %31, %32 : vector<16x128xf32>
      %34 = math.tanh %33 : vector<16x128xf32>
      %35 = arith.mulf %28, %34 : vector<16x128xf32>
      %36 = arith.addi %3, %c0_i32_11 : i32
      %37 = vector.broadcast %36 : i32 to vector<16x1xi32>
      %38 = arith.cmpi slt, %37, %12 : vector<16x1xi32>
      %39 = arith.extui %38 : vector<16x1xi1> to vector<16x1xi32>
      %40 = arith.sitofp %39 : vector<16x1xi32> to vector<16x1xf32>
      %41 = arith.subf %35, %13 : vector<16x128xf32>
      %42 = vector.broadcast %40 : vector<16x1xf32> to vector<16x128xf32>
      %43 = arith.mulf %42, %41 : vector<16x128xf32>
      %44 = arith.addf %13, %43 : vector<16x128xf32>
      %45 = arith.subf %33, %14 : vector<16x128xf32>
      %46 = vector.broadcast %40 : vector<16x1xf32> to vector<16x128xf32>
      %47 = arith.mulf %46, %45 : vector<16x128xf32>
      %48 = arith.addf %14, %47 : vector<16x128xf32>
      %c1_i32_15 = arith.constant 1 : i32
      %49 = arith.index_cast %c1_i32_15 : i32 to index
      %c0_16 = arith.constant 0 : index
      %c0_17 = arith.constant 0 : index
      %50 = vector.load %arg3[%49, %c0_16, %c0_17] : memref<4x16x512xf32, #tpu.memory_space<vmem>>, vector<1x16x512xf32>
      %51 = vector.shape_cast %50 : vector<1x16x512xf32> to vector<16x512xf32>
      %cst_18 = arith.constant dense<0.000000e+00> : vector<16x512xf32>
      %52 = tpu.matmul %44, %11, %cst_18 {dimension_numbers = #tpu.dot_dimension_numbers<[1], [0], [0], [1], [0, 0, 1, 1], [], []>} : vector<16x128xf32>, vector<128x512xf32>, vector<16x512xf32> -> vector<16x512xf32>
      %53 = arith.addf %51, %52 : vector<16x512xf32>
      %54 = vector.extract_strided_slice %53 {offsets = [0, 0], sizes = [16, 384], strides = [1, 1]} : vector<16x512xf32> to vector<16x384xf32>
      %55 = arith.negf %54 : vector<16x384xf32>
      %56 = math.exp %55 : vector<16x384xf32>
      %cst_19 = arith.constant 1.000000e+00 : f32
      %57 = vector.broadcast %cst_19 : f32 to vector<16x384xf32>
      %58 = arith.addf %57, %56 : vector<16x384xf32>
      %59 = arith.divf %57, %58 : vector<16x384xf32>
      %60 = vector.extract_strided_slice %59 {offsets = [0, 0], sizes = [16, 128], strides = [1, 1]} : vector<16x384xf32> to vector<16x128xf32>
      %61 = vector.extract_strided_slice %59 {offsets = [0, 128], sizes = [16, 128], strides = [1, 1]} : vector<16x384xf32> to vector<16x128xf32>
      %62 = vector.extract_strided_slice %59 {offsets = [0, 256], sizes = [16, 128], strides = [1, 1]} : vector<16x384xf32> to vector<16x128xf32>
      %63 = vector.extract_strided_slice %53 {offsets = [0, 384], sizes = [16, 128], strides = [1, 1]} : vector<16x512xf32> to vector<16x128xf32>
      %64 = math.tanh %63 : vector<16x128xf32>
      %65 = arith.mulf %61, %48 : vector<16x128xf32>
      %66 = arith.mulf %60, %64 : vector<16x128xf32>
      %67 = arith.addf %65, %66 : vector<16x128xf32>
      %68 = math.tanh %67 : vector<16x128xf32>
      %69 = arith.mulf %62, %68 : vector<16x128xf32>
      %70 = arith.addi %3, %c1_i32_15 : i32
      %71 = vector.broadcast %70 : i32 to vector<16x1xi32>
      %72 = arith.cmpi slt, %71, %12 : vector<16x1xi32>
      %73 = arith.extui %72 : vector<16x1xi1> to vector<16x1xi32>
      %74 = arith.sitofp %73 : vector<16x1xi32> to vector<16x1xf32>
      %75 = arith.subf %69, %44 : vector<16x128xf32>
      %76 = vector.broadcast %74 : vector<16x1xf32> to vector<16x128xf32>
      %77 = arith.mulf %76, %75 : vector<16x128xf32>
      %78 = arith.addf %44, %77 : vector<16x128xf32>
      %79 = arith.subf %67, %48 : vector<16x128xf32>
      %80 = vector.broadcast %74 : vector<16x1xf32> to vector<16x128xf32>
      %81 = arith.mulf %80, %79 : vector<16x128xf32>
      %82 = arith.addf %48, %81 : vector<16x128xf32>
      %c2_i32 = arith.constant 2 : i32
      %83 = arith.index_cast %c2_i32 : i32 to index
      %c0_20 = arith.constant 0 : index
      %c0_21 = arith.constant 0 : index
      %84 = vector.load %arg3[%83, %c0_20, %c0_21] : memref<4x16x512xf32, #tpu.memory_space<vmem>>, vector<1x16x512xf32>
      %85 = vector.shape_cast %84 : vector<1x16x512xf32> to vector<16x512xf32>
      %cst_22 = arith.constant dense<0.000000e+00> : vector<16x512xf32>
      %86 = tpu.matmul %78, %11, %cst_22 {dimension_numbers = #tpu.dot_dimension_numbers<[1], [0], [0], [1], [0, 0, 1, 1], [], []>} : vector<16x128xf32>, vector<128x512xf32>, vector<16x512xf32> -> vector<16x512xf32>
      %87 = arith.addf %85, %86 : vector<16x512xf32>
      %88 = vector.extract_strided_slice %87 {offsets = [0, 0], sizes = [16, 384], strides = [1, 1]} : vector<16x512xf32> to vector<16x384xf32>
      %89 = arith.negf %88 : vector<16x384xf32>
      %90 = math.exp %89 : vector<16x384xf32>
      %cst_23 = arith.constant 1.000000e+00 : f32
      %91 = vector.broadcast %cst_23 : f32 to vector<16x384xf32>
      %92 = arith.addf %91, %90 : vector<16x384xf32>
      %93 = arith.divf %91, %92 : vector<16x384xf32>
      %94 = vector.extract_strided_slice %93 {offsets = [0, 0], sizes = [16, 128], strides = [1, 1]} : vector<16x384xf32> to vector<16x128xf32>
      %95 = vector.extract_strided_slice %93 {offsets = [0, 128], sizes = [16, 128], strides = [1, 1]} : vector<16x384xf32> to vector<16x128xf32>
      %96 = vector.extract_strided_slice %93 {offsets = [0, 256], sizes = [16, 128], strides = [1, 1]} : vector<16x384xf32> to vector<16x128xf32>
      %97 = vector.extract_strided_slice %87 {offsets = [0, 384], sizes = [16, 128], strides = [1, 1]} : vector<16x512xf32> to vector<16x128xf32>
      %98 = math.tanh %97 : vector<16x128xf32>
      %99 = arith.mulf %95, %82 : vector<16x128xf32>
      %100 = arith.mulf %94, %98 : vector<16x128xf32>
      %101 = arith.addf %99, %100 : vector<16x128xf32>
      %102 = math.tanh %101 : vector<16x128xf32>
      %103 = arith.mulf %96, %102 : vector<16x128xf32>
      %104 = arith.addi %3, %c2_i32 : i32
      %105 = vector.broadcast %104 : i32 to vector<16x1xi32>
      %106 = arith.cmpi slt, %105, %12 : vector<16x1xi32>
      %107 = arith.extui %106 : vector<16x1xi1> to vector<16x1xi32>
      %108 = arith.sitofp %107 : vector<16x1xi32> to vector<16x1xf32>
      %109 = arith.subf %103, %78 : vector<16x128xf32>
      %110 = vector.broadcast %108 : vector<16x1xf32> to vector<16x128xf32>
      %111 = arith.mulf %110, %109 : vector<16x128xf32>
      %112 = arith.addf %78, %111 : vector<16x128xf32>
      %113 = arith.subf %101, %82 : vector<16x128xf32>
      %114 = vector.broadcast %108 : vector<16x1xf32> to vector<16x128xf32>
      %115 = arith.mulf %114, %113 : vector<16x128xf32>
      %116 = arith.addf %82, %115 : vector<16x128xf32>
      %c3_i32 = arith.constant 3 : i32
      %117 = arith.index_cast %c3_i32 : i32 to index
      %c0_24 = arith.constant 0 : index
      %c0_25 = arith.constant 0 : index
      %118 = vector.load %arg3[%117, %c0_24, %c0_25] : memref<4x16x512xf32, #tpu.memory_space<vmem>>, vector<1x16x512xf32>
      %119 = vector.shape_cast %118 : vector<1x16x512xf32> to vector<16x512xf32>
      %cst_26 = arith.constant dense<0.000000e+00> : vector<16x512xf32>
      %120 = tpu.matmul %112, %11, %cst_26 {dimension_numbers = #tpu.dot_dimension_numbers<[1], [0], [0], [1], [0, 0, 1, 1], [], []>} : vector<16x128xf32>, vector<128x512xf32>, vector<16x512xf32> -> vector<16x512xf32>
      %121 = arith.addf %119, %120 : vector<16x512xf32>
      %122 = vector.extract_strided_slice %121 {offsets = [0, 0], sizes = [16, 384], strides = [1, 1]} : vector<16x512xf32> to vector<16x384xf32>
      %123 = arith.negf %122 : vector<16x384xf32>
      %124 = math.exp %123 : vector<16x384xf32>
      %cst_27 = arith.constant 1.000000e+00 : f32
      %125 = vector.broadcast %cst_27 : f32 to vector<16x384xf32>
      %126 = arith.addf %125, %124 : vector<16x384xf32>
      %127 = arith.divf %125, %126 : vector<16x384xf32>
      %128 = vector.extract_strided_slice %127 {offsets = [0, 0], sizes = [16, 128], strides = [1, 1]} : vector<16x384xf32> to vector<16x128xf32>
      %129 = vector.extract_strided_slice %127 {offsets = [0, 128], sizes = [16, 128], strides = [1, 1]} : vector<16x384xf32> to vector<16x128xf32>
      %130 = vector.extract_strided_slice %127 {offsets = [0, 256], sizes = [16, 128], strides = [1, 1]} : vector<16x384xf32> to vector<16x128xf32>
      %131 = vector.extract_strided_slice %121 {offsets = [0, 384], sizes = [16, 128], strides = [1, 1]} : vector<16x512xf32> to vector<16x128xf32>
      %132 = math.tanh %131 : vector<16x128xf32>
      %133 = arith.mulf %129, %116 : vector<16x128xf32>
      %134 = arith.mulf %128, %132 : vector<16x128xf32>
      %135 = arith.addf %133, %134 : vector<16x128xf32>
      %136 = math.tanh %135 : vector<16x128xf32>
      %137 = arith.mulf %130, %136 : vector<16x128xf32>
      %138 = arith.addi %3, %c3_i32 : i32
      %139 = vector.broadcast %138 : i32 to vector<16x1xi32>
      %140 = arith.cmpi slt, %139, %12 : vector<16x1xi32>
      %141 = arith.extui %140 : vector<16x1xi1> to vector<16x1xi32>
      %142 = arith.sitofp %141 : vector<16x1xi32> to vector<16x1xf32>
      %143 = arith.subf %137, %112 : vector<16x128xf32>
      %144 = vector.broadcast %142 : vector<16x1xf32> to vector<16x128xf32>
      %145 = arith.mulf %144, %143 : vector<16x128xf32>
      %146 = arith.addf %112, %145 : vector<16x128xf32>
      %147 = arith.subf %135, %116 : vector<16x128xf32>
      %148 = vector.broadcast %142 : vector<16x1xf32> to vector<16x128xf32>
      %149 = arith.mulf %148, %147 : vector<16x128xf32>
      %150 = arith.addf %116, %149 : vector<16x128xf32>
      %c4_i32_28 = arith.constant 4 : i32
      %c0_29 = arith.constant 0 : index
      %c0_30 = arith.constant 0 : index
      %151 = vector.load %arg7[%c0_29, %c0_30] : memref<16x128xf32, #tpu.memory_space<vmem>>, vector<16x128xf32>
      tpu.vector_store %arg7[%c0_29, %c0_30], %146 {strides = array<i32>} : memref<16x128xf32, #tpu.memory_space<vmem>>, vector<16x128xf32>,
      %c0_31 = arith.constant 0 : index
      %c0_32 = arith.constant 0 : index
      %152 = vector.load %arg8[%c0_31, %c0_32] : memref<16x128xf32, #tpu.memory_space<vmem>>, vector<16x128xf32>
      tpu.vector_store %arg8[%c0_31, %c0_32], %150 {strides = array<i32>} : memref<16x128xf32, #tpu.memory_space<vmem>>, vector<16x128xf32>,
    } else {
    }
    %c1_i32 = arith.constant 1 : i32
    %8 = arith.cmpi eq, %arg1, %c1_i32 : i32
    %9 = arith.extui %8 : i1 to i32
    %c0_i32_2 = arith.constant 0 : i32
    %10 = arith.cmpi ne, %9, %c0_i32_2 : i32
    scf.if %10 {
      %c0_3 = arith.constant 0 : index
      %c0_4 = arith.constant 0 : index
      %11 = vector.load %arg7[%c0_3, %c0_4] : memref<16x128xf32, #tpu.memory_space<vmem>>, vector<16x128xf32>
      %c0_5 = arith.constant 0 : index
      %c0_6 = arith.constant 0 : index
      %12 = vector.load %arg6[%c0_5, %c0_6] : memref<16x128xf32, #tpu.memory_space<vmem>>, vector<16x128xf32>
      tpu.vector_store %arg6[%c0_5, %c0_6], %11 {strides = array<i32>} : memref<16x128xf32, #tpu.memory_space<vmem>>, vector<16x128xf32>,
    } else {
    }
    return
  }
  func.func @transform_0(%arg0: i32, %arg1: i32, %arg2: memref<1xi32, #tpu.memory_space<smem>>) -> (i32, i32, i32) {
    %c0_i32 = arith.constant 0 : i32
    %c0_i32_0 = arith.constant 0 : i32
    return %arg1, %arg0, %c0_i32 : i32, i32, i32
  }
  func.func @transform_1(%arg0: i32, %arg1: i32, %arg2: memref<1xi32, #tpu.memory_space<smem>>) -> (i32, i32) {
    %c0_i32 = arith.constant 0 : i32
    %c0_i32_0 = arith.constant 0 : i32
    return %arg0, %c0_i32 : i32, i32
  }
  func.func @transform_2(%arg0: i32, %arg1: i32, %arg2: memref<1xi32, #tpu.memory_space<smem>>) -> (i32, i32) {
    %c0_i32 = arith.constant 0 : i32
    %c0_i32_0 = arith.constant 0 : i32
    %c0_i32_1 = arith.constant 0 : i32
    return %c0_i32, %c0_i32_0 : i32, i32
  }
  func.func @transform_3(%arg0: i32, %arg1: i32, %arg2: memref<1xi32, #tpu.memory_space<smem>>) -> (i32, i32) {
    %c0_i32 = arith.constant 0 : i32
    %c0_i32_0 = arith.constant 0 : i32
    return %arg0, %c0_i32 : i32, i32
  }
}

</mosaic_0001>

<bundles_post_ra>
// kernel: tpu_custom_call.1
= control target key start
LH: loop header
LB: loop body
LE: loop exit
PB: predicated region body
PF: predicated region fallthrough
CT: control target
= control target key end

     0   :  { %s2611_s0 = inlined_call_operand.<no memory space> [shape: s32[1], index: 0, kind: input, shape index: {}]   ;;  %s2612_s1 = inlined_call_operand.hbm [shape: f32[8,16,512], index: 1, kind: input, shape index: {}]   ;;  %s2613_s2 = inlined_call_operand.vmem [shape: s32[16,1], index: 2, kind: input, shape index: {}]   ;;  %s2614_s3 = inlined_call_operand.hbm [shape: f32[128,512], index: 3, kind: input, shape index: {}]   ;;  %s2615_s4 = inlined_call_operand.hbm [shape: f32[16,128], index: 4, kind: output, shape index: {}]  }
   0x1   :  { %9 = sst [smem:[#allocation5]] %s2611_s0 }
   0x2   :  { %10 = vsyncpa [#allocation7], 0 }
   0x3   :  { %12 = vsyncpa [#allocation7 + $0x1], 0 }
   0x4   :  { %13 = vsyncpa [#allocation10], 0 }
   0x5   :  { %14 = vsyncpa [#allocation8], 0  ;;  %s1902_s17 = smov 0   ;;  %s1904_s18 = smov 0  }
   0x6   :  { %s1906_s19 = smov 0   ;;  %s1908_s20 = smov 0  }
   0x7   :  { %s1910_s21 = smov 0   ;;  %s1912_s22 = smov 0  }
   0x8 LB: > { %s1433_s0 = sadd.s32 4294967295, %s1862_s22   ;;  %p54_p0 = scmp.ne.s32.totalorder %s1846_s18, %s1842_s17  ;;  %s1862_s22 = sphi %s1912_s22, %s20_s22   ;;  %s1858_s21 = sphi %s1910_s21, %s2777_s21   ;;  %s1854_s20 = sphi %s1908_s20, %s2776_s20   ;;  %s1850_s19 = sphi %s1906_s19, %s2775_s19   ;;  %s1846_s18 = sphi %s1904_s18, %s2774_s18   ;;  %s1842_s17 = sphi %s1902_s17, %s2773_s17  }
   0x9   : > { %p1934_p1 = scmp.eq.s32.totalorder %s1433_s0, 0  ;;  %p1434_p2 = scmp.ge.s32.totalorder %s1862_s22, 1 }
   0xa   : > { %p138_p3 = scmp.lt.s32.totalorder %s1862_s22, 3  ;;  %s1864_s26 = smov [#allocation9]  }
   0xb   : > { %p1942_p4 = por %p1934_p1, %p54_p0  ;;  %s159_s27 = sshll.u32 %s1864_s26, 4  ;;  %s160_s27 = int_to_ptr.vmem [resolvable:$true] %s159_s27 }
   0xc   : > { %p1946_p5 = pnand %p1434_p2, %p138_p3  ;;  %s29_s29 = sadd.s32 1, %s1858_s21 }
   0xd   : > { %s1737_s30 = scalar_lea.vmem %s160_s27, 8192  ;;  %p1745_p12 = scmp.lt.s32.totalorder %s160_s27, %s160_s27 }
   0xe   : > { %p1521_p6 = pneg %p1946_p5  ;;  %p1738_p9 = scmp.ne.s32.totalorder %s160_s27, %s1737_s30 }
   0xf   : > { %p1746_p13 = scmp.lt.s32.totalorder %s1737_s30, %s1737_s30 }
  0x10   : > { %p1954_p7 = pnand %p1521_p6, %p1934_p1 }
  0x11   : > { %p1747_p0 = por %p1746_p13, %p1745_p12 }
  0x12   : > { %p1728_p8 = pneg %p1954_p7 }
  0x14   : > { %p1740_p10 = pnand %p1738_p9, %p1728_p8 }
  0x16   : > { %p1741_p11 = pneg %p1740_p10 }
  0x18   : > { %p1748_p2 = pnand %p1747_p0, %p1741_p11 }
  0x1a   : > { %1751 = shalt.err (!%p1748_p2)
}
  0x1b   : > { %s1865_s5 = smov 512   ;;  %s1866_s6 = smov 32  }
  0x1c   : > { %1524 = dma.hbm_to_vmem [thread:$0]  (!%p1954_p7), %s2614_s3, 8192, %s160_s27, [#allocation10], %s1865_s5, %s1865_s5, %s1866_s6  }
  0x1d   : > { %p30_p3 = scmp.ge.s32.totalorder %s29_s29, 2  ;;  %s41_s9 = sadd.s32 1, %s1850_s19 }
  0x1e   : > { %p48_p6 = scmp.ne.s32.totalorder %s1850_s19, %s1846_s18  ;;  %p49_p8 = scmp.eq.s32.totalorder %s1862_s22, 0 }
  0x1f   : > { %s2779_s29 = smov (%p30_p3, %s29_s29), 0  ;;  %p1530_p10 = scmp.lt.s32.totalorder %s1862_s22, 2 }
  0x20   : > { %p50_p9 = por %p49_p8, %p48_p6  ;;  %s36_s10 = ssub.s32 %s1858_s21, %s2779_s29 }
  0x21   : > { %s173_s11 = sand.u32 1, %s1850_s19   ;;  %p39_p11 = scmp.eq.s32.totalorder %s36_s10, 0 }
  0x22   : > { %s1438_s12 = sshll.u32 %s173_s11, 8  ;;  %s1510_s13 = sshll.u32 %s1858_s21, 12 }
  0x23   : > { %s1981_s14 = scalar_select %p39_p11, %s1850_s19, %s41_s9  }
  0x24   : > { %s187_s17 = scalar_lea.hbm %s2612_s1, %s1510_s13  ;;  %s177_s26 = scalar_lea.vmem [#allocation6], %s1438_s12 }
  0x25   : > { %s188_s27 = sshll.u32 %s177_s26, 4  ;;  %p1986_p7 = pnand %p1530_p10, %p50_p9  ;;  %s189_s27 = int_to_ptr.vmem [resolvable:$true] %s188_s27 }
  0x26   : > { %s174_s30 = scalar_lea.sflag [#allocation7], %s173_s11  ;;  %s1765_s7 = scalar_lea.vmem %s189_s27, 4096 }
  0x27   : > { %p1754_p12 = pneg %p1986_p7  ;;  %p1766_p13 = scmp.ne.s32.totalorder %s189_s27, %s1765_s7 }
  0x28   : > { %s1867_s8 = smov [#allocation6]  }
  0x29   : > { %p1768_p0 = pnand %p1766_p13, %p1754_p12  ;;  %s1770_s9 = sshll.u32 %s1867_s8, 4  ;;  %s1771_s9 = int_to_ptr.vmem [resolvable:$false] %s1770_s9 }
  0x2a   : > { %s1772_s10 = scalar_lea.vmem %s1771_s9, 8192  ;;  %p1773_p3 = scmp.lt.s32.totalorder %s189_s27, %s1771_s9 }
  0x2b   : > { %p1769_p2 = pneg %p1768_p0  ;;  %p1774_p6 = scmp.lt.s32.totalorder %s1772_s10, %s1765_s7 }
  0x2d   : > { %p1775_p8 = por %p1774_p6, %p1773_p3 }
  0x2f   : > { %p1776_p9 = pnand %p1775_p8, %p1769_p2 }
  0x31   : > { %1779 = shalt.err (!%p1776_p9)
}
  0x32   : > { %1528 = dma.hbm_to_vmem [thread:$0]  (!%p1986_p7), %s187_s17, 4096, %s189_s27, %s174_s30, %s1865_s5, %s1865_s5, %s1866_s6  }
  0x33   : > { %200 = sbr.rel (%p1946_p5) target bundleno = 1165 (0x48d), region = 32  ;;  %s202_s11 = sand.u32 (!%p1946_p5), 1, %s1846_s18  }
  0x34   : > { %s1443_s12 = sshll.u32 (!%p1946_p5), %s202_s11, 8  ;;  %s203_s13 = scalar_lea.sflag (!%p1946_p5), [#allocation7], %s202_s11 }
  0x35   : > { %s2000_s15 = scalar_lea.vmem (!%p1946_p5), [#allocation6], %s1443_s12 }
  0x38   : > { %1829 = dma.done.wait (%p1942_p4), %s203_s13, 4096  }
  0x39   : > { %1831 = vsyncadd (%p1942_p4), %s203_s13, 4294963200 }
  0x3a   : > { %1833 = dma.done.wait (%p1934_p1), [#allocation10], 8192  }
  0x3b   : > { %1835 = vsyncadd (%p1934_p1), [#allocation10], 4294959104  ;;  %p1445_p5 = scmp.ne.s32.totalorder %s1854_s20, 0 }
  0x3d   : > { %245 = sbr.rel (%p1445_p5) target bundleno = 69 (0x45), region = 44 }
  0x42   : > { %v1868_v0 = vmov 0.0  }
  0x43   : > { %246 = vst [vmem:[#allocation2] sm:$0xff] %v1868_v0  ;;  %247 = vst [vmem:[#allocation2 + $0x8] sm:$0xff] %v1868_v0 }
  0x44   : > { %248 = vst [vmem:[#allocation3 + $0x8] sm:$0xff] %v1868_v0  ;;  %249 = vst [vmem:[#allocation3] sm:$0xff] %v1868_v0 }
  0x45 PF: > { %s2012_s25 = sshll.u32 %s1854_s20, 2  ;;  %s251_s24 = sld [smem:[#allocation5]] }
  0x4b   : > { %p1447_p4 = scmp.ge.s32.totalorder %s2012_s25, %s251_s24 }
  0x4d   : > { %255 = sbr.rel (%p1447_p4) target bundleno = 1140 (0x474), region = 48 }
  0x52   : > { %v2015_v1 = vld [vmem:[#allocation9 + $0x1e8] sm:$0xff]  ;;  %v2017_v2 = vld [vmem:[#allocation9 + $0x1e0] sm:$0xff]  ;;  %v2616_v5 = vmov 0.0   ;;  %v1870_v8 = vmov 0   ;;  %v2038_v11 = vld [vmem:[#allocation9 + $0x1f8] sm:$0xff]  ;;  %v544_v57 = vstv %s2012_s25  ;;  %s1041_s17 = sadd.s32 2, %s2012_s25 }
  0x53   : > { %2677 = vst [vmem:[#allocation15_spill] sm:$0xff] %v2015_v1  ;;  %v2019_v3 = vld [vmem:[#allocation9 + $0x1c8] sm:$0xff]  ;;  %334 = vmatprep.subr.mxu0 %v2015_v1  ;;  %v2022_v4 = vld [vmem:[#allocation9 + $0x1c0] sm:$0xff]  ;;  %398 = vmatprep.mubr.f32.mxu0 %v2616_v5  ;;  %2678 = vst [vmem:[#allocation16_spill] sm:$0xff] %v2038_v11  ;;  %s1290_s26 = sadd.s32 3, %s2012_s25  ;;  %s792_s27 = sadd.s32 1, %s2012_s25 }
  0x54   : > { %335 = vmatpush1.msra.mxu0 %v2017_v2  ;;  %v2026_v6 = vld [vmem:[#allocation9 + $0x1a8] sm:$0xff]  ;;  %475 = vmatprep.mubr.f32.mxu1 %v2616_v5  ;;  %v2030_v7 = vld [vmem:[#allocation9 + $0x1a0] sm:$0xff]  ;;  %v2044_v13 = vld [vmem:[#allocation9 + $0x1f0] sm:$0xff] }
  0x55   : > { %336 = vmatprep.subr.mxu0 %v2019_v3  ;;  %1591 = vset.pattern.permute.xlu0 %v1870_v8  ;;  %v2033_v9 = vld [vmem:[#allocation9 + $0x188] sm:$0xff]  ;;  %v2036_v10 = vld [vmem:[#allocation9 + $0x180] sm:$0xff]  ;;  %v2050_v15 = vld [vmem:[#allocation9 + $0x1d8] sm:$0xff] }
  0x56   : > { %337 = vmatpush1.msra.mxu0 %v2022_v4  ;;  %1592 = vset.pattern.permute.xlu1 %v1870_v8  ;;  %v2041_v12 = vld [vmem:[#allocation9 + $0x168] sm:$0xff]  ;;  %v2047_v14 = vld [vmem:[#allocation9 + $0x160] sm:$0xff]  ;;  %v2052_v16 = vld [vmem:[#allocation9 + $0x1d0] sm:$0xff] }
  0x57   : > { %338 = vmatprep.subr.mxu0 %v2026_v6  ;;  %411 = vmatprep.subr.mxu1 %v2038_v11  ;;  %v2055_v17 = vld [vmem:[#allocation9 + $0x148] sm:$0xff]  ;;  %v2058_v18 = vld [vmem:[#allocation9 + $0x1b8] sm:$0xff]  ;;  %v2061_v19 = vld [vmem:[#allocation9 + $0x140] sm:$0xff] }
  0x58   : > { %339 = vmatpush1.msra.mxu0 %v2030_v7  ;;  %412 = vmatpush1.msra.mxu1 %v2044_v13  ;;  %v2064_v20 = vld [vmem:[#allocation9 + $0x1b0] sm:$0xff]  ;;  %v2066_v21 = vld [vmem:[#allocation9 + $0x198] sm:$0xff]  ;;  %v2069_v22 = vld [vmem:[#allocation9 + $0x128] sm:$0xff] }
  0x59   : > { %340 = vmatprep.subr.mxu0 %v2033_v9  ;;  %413 = vmatprep.subr.mxu1 %v2050_v15  ;;  %v2072_v23 = vld [vmem:[#allocation9 + $0x190] sm:$0xff]  ;;  %v2075_v24 = vld [vmem:[#allocation9 + $0x120] sm:$0xff]  ;;  %v2078_v25 = vld [vmem:[#allocation9 + $0x178] sm:$0xff] }
  0x5a   : > { %341 = vmatpush1.msra.mxu0 %v2036_v10  ;;  %414 = vmatpush1.msra.mxu1 %v2052_v16  ;;  %v2081_v26 = vld [vmem:[#allocation9 + $0x108] sm:$0xff]  ;;  %v2084_v27 = vld [vmem:[#allocation9 + $0x170] sm:$0xff]  ;;  %v2087_v28 = vld [vmem:[#allocation9 + $0x100] sm:$0xff] }
  0x5b   : > { %342 = vmatprep.subr.mxu0 %v2041_v12  ;;  %415 = vmatprep.subr.mxu1 %v2058_v18  ;;  %v2090_v29 = vld [vmem:[#allocation9 + $0x158] sm:$0xff]  ;;  %v2093_v30 = vld [vmem:[#allocation9 + $0xe8] sm:$0xff]  ;;  %v2096_v31 = vld [vmem:[#allocation9 + $0x150] sm:$0xff] }
  0x5c   : > { %343 = vmatpush1.msra.mxu0 %v2047_v14  ;;  %416 = vmatpush1.msra.mxu1 %v2064_v20  ;;  %v2099_v32 = vld [vmem:[#allocation9 + $0xe0] sm:$0xff]  ;;  %v2102_v33 = vld [vmem:[#allocation9 + $0x138] sm:$0xff]  ;;  %v2105_v34 = vld [vmem:[#allocation9 + $0xc8] sm:$0xff] }
  0x5d   : > { %344 = vmatprep.subr.mxu0 %v2055_v17  ;;  %417 = vmatprep.subr.mxu1 %v2066_v21  ;;  %2679 = vst [vmem:[#allocation17_spill] sm:$0xff] %v2105_v34  ;;  %v2108_v35 = vld [vmem:[#allocation9 + $0x130] sm:$0xff]  ;;  %v2111_v36 = vld [vmem:[#allocation9 + $0xc0] sm:$0xff]  ;;  %v2114_v37 = vld [vmem:[#allocation9 + $0x118] sm:$0xff] }
  0x5e   : > { %345 = vmatpush1.msra.mxu0 %v2061_v19  ;;  %418 = vmatpush1.msra.mxu1 %v2072_v23  ;;  %2680 = vst [vmem:[#allocation18_spill] sm:$0xff] %v2111_v36  ;;  %v2117_v38 = vld [vmem:[#allocation9 + $0xa8] sm:$0xff]  ;;  %v2120_v39 = vld [vmem:[#allocation9 + $0x110] sm:$0xff]  ;;  %v2123_v40 = vld [vmem:[#allocation9 + $0xa0] sm:$0xff] }
  0x5f   : > { %346 = vmatprep.subr.mxu0 %v2069_v22  ;;  %419 = vmatprep.subr.mxu1 %v2078_v25  ;;  %2681 = vst [vmem:[#allocation19_spill] sm:$0xff] %v2117_v38  ;;  %2682 = vst [vmem:[#allocation20_spill] sm:$0xff] %v2123_v40  ;;  %v2126_v41 = vld [vmem:[#allocation9 + $0xf8] sm:$0xff]  ;;  %v2129_v42 = vld [vmem:[#allocation9 + $0x88] sm:$0xff] }
  0x60   : > { %347 = vmatpush1.msra.mxu0 %v2075_v24  ;;  %420 = vmatpush1.msra.mxu1 %v2084_v27  ;;  %2683 = vst [vmem:[#allocation21_spill] sm:$0xff] %v2129_v42  ;;  %v2132_v43 = vld [vmem:[#allocation9 + $0xf0] sm:$0xff]  ;;  %v2135_v44 = vld [vmem:[#allocation9 + $0x80] sm:$0xff]  ;;  %v2138_v45 = vld [vmem:[#allocation9 + $0xd8] sm:$0xff] }
  0x61   : > { %348 = vmatprep.subr.mxu0 %v2081_v26  ;;  %421 = vmatprep.subr.mxu1 %v2090_v29  ;;  %2684 = vst [vmem:[#allocation22_spill] sm:$0xff] %v2135_v44  ;;  %2685 = vst [vmem:[#allocation23_spill] sm:$0xff] %v2138_v45  ;;  %v2141_v46 = vld [vmem:[#allocation9 + $0x68] sm:$0xff]  ;;  %v2144_v47 = vld [vmem:[#allocation9 + $0xd0] sm:$0xff] }
  0x62   : > { %349 = vmatpush1.msra.mxu0 %v2087_v28  ;;  %422 = vmatpush1.msra.mxu1 %v2096_v31  ;;  %2686 = vst [vmem:[#allocation24_spill] sm:$0xff] %v2141_v46  ;;  %2687 = vst [vmem:[#allocation25_spill] sm:$0xff] %v2144_v47  ;;  %v2147_v48 = vld [vmem:[#allocation9 + $0x60] sm:$0xff]  ;;  %v2150_v49 = vld [vmem:[#allocation9 + $0xb8] sm:$0xff] }
  0x63   : > { %350 = vmatprep.subr.mxu0 %v2093_v30  ;;  %423 = vmatprep.subr.mxu1 %v2102_v33  ;;  %2688 = vst [vmem:[#allocation26_spill] sm:$0xff] %v2147_v48  ;;  %2689 = vst [vmem:[#allocation27_spill] sm:$0xff] %v2150_v49  ;;  %v2153_v50 = vld [vmem:[#allocation9 + $0x48] sm:$0xff]  ;;  %v2156_v51 = vld [vmem:[#allocation9 + $0xb0] sm:$0xff] }
  0x64   : > { %351 = vmatpush1.msra.mxu0 %v2099_v32  ;;  %424 = vmatpush1.msra.mxu1 %v2108_v35  ;;  %2690 = vst [vmem:[#allocation28_spill] sm:$0xff] %v2153_v50  ;;  %2691 = vst [vmem:[#allocation29_spill] sm:$0xff] %v2156_v51  ;;  %v2159_v52 = vld [vmem:[#allocation9 + $0x40] sm:$0xff]  ;;  %v2162_v53 = vld [vmem:[#allocation9 + $0x98] sm:$0xff] }
  0x65   : > { %352 = vmatprep.subr.mxu0 %v2105_v34  ;;  %425 = vmatprep.subr.mxu1 %v2114_v37  ;;  %2692 = vst [vmem:[#allocation30_spill] sm:$0xff] %v2159_v52  ;;  %2693 = vst [vmem:[#allocation31_spill] sm:$0xff] %v2162_v53  ;;  %v2165_v54 = vld [vmem:[#allocation9 + $0x28] sm:$0xff]  ;;  %v2168_v55 = vld [vmem:[#allocation9 + $0x90] sm:$0xff] }
  0x66   : > { %353 = vmatpush1.msra.mxu0 %v2111_v36  ;;  %426 = vmatpush1.msra.mxu1 %v2120_v39  ;;  %2694 = vst [vmem:[#allocation32_spill] sm:$0xff] %v2165_v54  ;;  %2695 = vst [vmem:[#allocation33_spill] sm:$0xff] %v2168_v55  ;;  %v2173_v56 = vld [vmem:[%s2613_s2] sm:$0xff]  ;;  %v2180_v59 = vld [vmem:[#allocation9 + $0x78] sm:$0xff] }
  0x67   : > { %354 = vmatprep.subr.mxu0 %v2117_v38  ;;  %427 = vmatprep.subr.mxu1 %v2126_v41  ;;  %v2177_v58 = vld [vmem:[#allocation9 + $0x20] sm:$0xff]  ;;  %2697 = vst [vmem:[#allocation35_spill] sm:$0xff] %v2180_v59  ;;  %v2183_v60 = vld [vmem:[#allocation9 + $0x8] sm:$0xff]  ;;  %v2186_v61 = vld [vmem:[#allocation9 + $0x70] sm:$0xff]  ;;  %vm545_vm0 = vcmp.lt.s32.totalorder %v544_v57, %v2173_v56 }
  0x68   : > { %355 = vmatpush1.msra.mxu0 %v2123_v40  ;;  %428 = vmatpush1.msra.mxu1 %v2132_v43  ;;  %2696 = vst [vmem:[#allocation34_spill] sm:$0xff] %v2177_v58  ;;  %2698 = vst [vmem:[#allocation36_spill] sm:$0xff] %v2183_v60  ;;  %v2189_v62 = vld [vmem:[#allocation9] sm:$0xff]  ;;  %v2192_v63 = vld [vmem:[#allocation9 + $0x58] sm:$0xff] }
  0x69   : > { %356 = vmatprep.subr.mxu0 %v2129_v42  ;;  %429 = vmatprep.subr.mxu1 %v2138_v45  ;;  %2699 = vst [vmem:[#allocation37_spill] sm:$0xff] %v2186_v61  ;;  %2700 = vst [vmem:[#allocation38_spill] sm:$0xff] %v2189_v62  ;;  %v2196_v0 = vld [vmem:[#allocation2] sm:$0xff]  ;;  %v2199_v8 = vld [vmem:[#allocation9 + $0x50] sm:$0xff] }
  0x6a   : > { %357 = vmatpush1.msra.mxu0 %v2135_v44  ;;  %430 = vmatpush1.msra.mxu1 %v2144_v47  ;;  %2701 = vst [vmem:[#allocation39_spill] sm:$0xff] %v2192_v63  ;;  %2702 = vst [vmem:[#allocation40_spill] sm:$0xff] %v2199_v8  ;;  %v2204_v5 = vld [vmem:[%s2613_s2 + $0x8] sm:$0xff] }
  0x6b   : > { %358 = vmatprep.subr.mxu0 %v2141_v46  ;;  %431 = vmatprep.subr.mxu1 %v2150_v49  ;;  %vm546_vm1 = vcmp.lt.s32.totalorder %v544_v57, %v2204_v5 }
  0x6c   : > { %359 = vmatpush1.msra.mxu0 %v2147_v48  ;;  %432 = vmatpush1.msra.mxu1 %v2156_v51  ;;  %v2219_v48 = vld [vmem:[#allocation9 + $0x18] sm:$0xff] }
  0x6d   : > { %360 = vmatprep.subr.mxu0 %v2153_v50  ;;  %433 = vmatprep.subr.mxu1 %v2162_v53  ;;  %2706 = vst [vmem:[#allocation43_spill] sm:$0xff] %v2219_v48 }
  0x6e   : > { %361 = vmatpush1.msra.mxu0 %v2159_v52  ;;  %434 = vmatpush1.msra.mxu1 %v2168_v55  ;;  %v2705_v52 = vmov 0.0  }
  0x6f   : > { %362 = vmatprep.subr.mxu0 %v2165_v54  ;;  %435 = vmatprep.subr.mxu1 %v2180_v59  ;;  %v2208_v54 = vld [vmem:[#allocation9 + $0x38] sm:$0xff]  ;;  %v1454_v50 = vsel %vm545_vm0, 1.0, %v2705_v52 }
  0x70   : > { %363 = vmatpush1.msra.mxu0 %v2177_v58  ;;  %436 = vmatpush1.msra.mxu1 %v2186_v61  ;;  %2703 = vst [vmem:[#allocation41_spill] sm:$0xff] %v2208_v54  ;;  %v2214_v58 = vld [vmem:[#allocation9 + $0x30] sm:$0xff]  ;;  %v1291_v61 = vstv %s1290_s26 }
  0x71   : > { %364 = vmatprep.subr.mxu0 %v2183_v60  ;;  %437 = vmatprep.subr.mxu1 %v2192_v63  ;;  %2704 = vst [vmem:[#allocation42_spill] sm:$0xff] %v2214_v58  ;;  %v2223_v60 = vld [vmem:[#allocation2 + $0x8] sm:$0xff]  ;;  %v2228_v63 = vstv %s1041_s17  ;;  %vm1292_vm3 = vcmp.lt.s32.totalorder %v1291_v61, %v2173_v56  ;;  %vm1293_vm4 = vcmp.lt.s32.totalorder %v1291_v61, %v2204_v5 }
  0x72   : > { %365 = vmatpush1.msra.mxu0 %v2189_v62  ;;  %438 = vmatpush1.msra.mxu1 %v2199_v8  ;;  %v2226_v62 = vld [vmem:[#allocation9 + $0x10] sm:$0xff]  ;;  %v1455_v8 = vsel %vm546_vm1, 1.0, %v2705_v52  ;;  %vm1043_vm2 = vcmp.lt.s32.totalorder %v2228_v63, %v2173_v56  ;;  %v1502_v57 = vsel %vm1292_vm3, 1.0, %v2705_v52  ;;  %vm1044_vm7 = vcmp.lt.s32.totalorder %v2228_v63, %v2204_v5 }
  0x73   : > { %399 = vmatmul.mubr.f32.vlgmr.msra.gmra.mxu0 %v2196_v0  ;;  %439 = vmatprep.subr.mxu1 %v2208_v54  ;;  %2707 = vst [vmem:[#allocation44_spill] sm:$0xff] %v2226_v62 }
  0x74   : > { %404 = vmatprep.mubr.f32.mxu0 %v2705_v52  ;;  %440 = vmatpush1.msra.mxu1 %v2214_v58 }
  0x75   : > { %555 = vperm.xlu0 %1591, %v1454_v50   ;;  %441 = vmatprep.subr.mxu1 %v2219_v48  ;;  %v1486_v50 = vsel %vm1043_vm2, 1.0, %v2705_v52 }
  0x76   : > { %582 = vmatprep.subr.mxu0 %v2015_v1  ;;  %442 = vmatpush1.msra.mxu1 %v2226_v62  ;;  %v1503_v1 = vsel %vm1293_vm4, 1.0, %v2705_v52 }
  0x77   : > { %405 = vmatmul.mubr.f32.gmra.mxu0 %v2223_v60  ;;  %476 = vmatmul.mubr.f32.vlgmr.msra.gmra.mxu1 %v2196_v0  ;;  %v1593_v61 = vpack.i.bf16 %v1503_v1, %v1502_v57  ;;  %v2708_v1 = vld [vmem:[#allocation26_spill] sm:$0xff]  ;;  %v2711_v57 = vld [vmem:[#allocation39_spill] sm:$0xff] }
  0x78   : > { %659 = vmatprep.subr.mxu1 %v2038_v11  ;;  %481 = vmatprep.mubr.f32.mxu1 %v2705_v52 }
  0x79   : > { %560 = vperm.xlu0 %1591, %v1455_v8   ;;  %583 = vmatpush1.msra.mxu0 %v2017_v2  ;;  %v2709_v8 = vld [vmem:[#allocation37_spill] sm:$0xff] }
  0x7a   : > { %660 = vmatpush1.msra.mxu1 %v2044_v13  ;;  %584 = vmatprep.subr.mxu0 %v2019_v3 }
  0x7b   : > { %661 = vmatprep.subr.mxu1 %v2050_v15  ;;  %482 = vmatmul.mubr.f32.gmra.mxu1 %v2223_v60 }
  0x7c   : > { %585 = vmatpush1.msra.mxu0 %v2022_v4  ;;  %662 = vmatpush1.msra.mxu1 %v2052_v16 }
  0x7d   : > { %1053 = vperm.xlu0 %1591, %v1486_v50   ;;  %586 = vmatprep.subr.mxu0 %v2026_v6  ;;  %v2710_v50 = vld [vmem:[#allocation28_spill] sm:$0xff] }
  0x7e   : > { %663 = vmatprep.subr.mxu1 %v2058_v18  ;;  %587 = vmatpush1.msra.mxu0 %v2030_v7 }
  0x7f   : > { %664 = vmatpush1.msra.mxu1 %v2064_v20  ;;  %588 = vmatprep.subr.mxu0 %v2033_v9 }
  0x80   : > { %665 = vmatprep.subr.mxu1 %v2066_v21  ;;  %589 = vmatpush1.msra.mxu0 %v2036_v10 }
  0x81   : > { %1594 = vperm.xlu0 %1591, %v1593_v61   ;;  %666 = vmatpush1.msra.mxu1 %v2072_v23  ;;  %v2712_v61 = vld [vmem:[#allocation30_spill] sm:$0xff] }
  0x82   : > { %590 = vmatprep.subr.mxu0 %v2041_v12  ;;  %667 = vmatprep.subr.mxu1 %v2078_v25 }
  0x83   : > { %591 = vmatpush1.msra.mxu0 %v2047_v14  ;;  %668 = vmatpush1.msra.mxu1 %v2084_v27 }
  0x84   : > { %592 = vmatprep.subr.mxu0 %v2055_v17  ;;  %669 = vmatprep.subr.mxu1 %v2090_v29 }
  0x85   : > { %593 = vmatpush1.msra.mxu0 %v2061_v19  ;;  %670 = vmatpush1.msra.mxu1 %v2096_v31 }
  0x86   : > { %594 = vmatprep.subr.mxu0 %v2069_v22  ;;  %671 = vmatprep.subr.mxu1 %v2102_v33 }
  0x87   : > { %595 = vmatpush1.msra.mxu0 %v2075_v24  ;;  %672 = vmatpush1.msra.mxu1 %v2108_v35 }
  0x88   : > { %596 = vmatprep.subr.mxu0 %v2081_v26  ;;  %673 = vmatprep.subr.mxu1 %v2114_v37 }
  0x89   : > { %597 = vmatpush1.msra.mxu0 %v2087_v28  ;;  %674 = vmatpush1.msra.mxu1 %v2120_v39 }
  0x8a   : > { %598 = vmatprep.subr.mxu0 %v2093_v30  ;;  %675 = vmatprep.subr.mxu1 %v2126_v41 }
  0x8b   : > { %599 = vmatpush1.msra.mxu0 %v2099_v32  ;;  %676 = vmatpush1.msra.mxu1 %v2132_v43 }
  0x8c   : > { %600 = vmatprep.subr.mxu0 %v2105_v34  ;;  %677 = vmatprep.subr.mxu1 %v2138_v45 }
  0x8d   : > { %601 = vmatpush1.msra.mxu0 %v2111_v36  ;;  %678 = vmatpush1.msra.mxu1 %v2144_v47 }
  0x8e   : > { %602 = vmatprep.subr.mxu0 %v2117_v38  ;;  %679 = vmatprep.subr.mxu1 %v2150_v49 }
  0x8f   : > { %603 = vmatpush1.msra.mxu0 %v2123_v40  ;;  %680 = vmatpush1.msra.mxu1 %v2156_v51 }
  0x90   : > { %604 = vmatprep.subr.mxu0 %v2129_v42  ;;  %681 = vmatprep.subr.mxu1 %v2162_v53  ;;  %v2713_v53 = vld [vmem:[#allocation40_spill] sm:$0xff] }
  0x91   : > { %605 = vmatpush1.msra.mxu0 %v2135_v44  ;;  %682 = vmatpush1.msra.mxu1 %v2168_v55  ;;  %v2714_v44 = vld [vmem:[#allocation32_spill] sm:$0xff] }
  0x92   : > { %606 = vmatprep.subr.mxu0 %v2141_v46  ;;  %683 = vmatprep.subr.mxu1 %v2180_v59  ;;  %v2715_v46 = vld [vmem:[#allocation34_spill] sm:$0xff]  ;;  %v328_v59 = vld [vmem:[%s2000_s15 + $0x10] sm:$0xff] }
  0x93   : > { %607 = vmatpush1.msra.mxu0 %v2708_v1  ;;  %684 = vmatpush1.msra.mxu1 %v2709_v8  ;;  %v2716_v1 = vld [vmem:[#allocation36_spill] sm:$0xff] }
  0x94   : > { %608 = vmatprep.subr.mxu0 %v2710_v50  ;;  %685 = vmatprep.subr.mxu1 %v2711_v57  ;;  %v2717_v50 = vld [vmem:[#allocation38_spill] sm:$0xff] }
  0x95   : > { %609 = vmatpush1.msra.mxu0 %v2712_v61  ;;  %686 = vmatpush1.msra.mxu1 %v2713_v53 }
  0x96   : > { %610 = vmatprep.subr.mxu0 %v2714_v44  ;;  %687 = vmatprep.subr.mxu1 %v2208_v54  ;;  %v2718_v44 = vld [vmem:[#allocation15_spill] sm:$0xff] }
  0x97   : > { %611 = vmatpush1.msra.mxu0 %v2715_v46  ;;  %688 = vmatpush1.msra.mxu1 %v2214_v58  ;;  %v793_v58 = vstv %s792_s27 }
  0x98   : > { %612 = vmatprep.subr.mxu0 %v2716_v1  ;;  %689 = vmatprep.subr.mxu1 %v2219_v48  ;;  %vm794_vm5 = vcmp.lt.s32.totalorder %v793_v58, %v2173_v56  ;;  %vm795_vm6 = vcmp.lt.s32.totalorder %v793_v58, %v2204_v5  ;;  %v327_v1 = vld [vmem:[%s2000_s15 + $0x8] sm:$0xff]  ;;  %v330_v58 = vld [vmem:[%s2000_s15 + $0x20] sm:$0xff] }
  0x99   : > { %613 = vmatpush1.msra.mxu0 %v2717_v50  ;;  %646 = vmatprep.mubr.f32.mxu0 %v2705_v52  ;;  %v1470_v50 = vsel %vm794_vm5, 1.0, %v2705_v52 }
  0x9a   : > { %690 = vmatpush1.msra.mxu1 %v2226_v62  ;;  %723 = vmatprep.mubr.f32.mxu1 %v2705_v52  ;;  %v1471_v62 = vsel %vm795_vm6, 1.0, %v2705_v52 }
  0x9b   : > { %831 = vmatprep.subr.mxu0 %v2718_v44  ;;  %908 = vmatprep.subr.mxu1 %v2038_v11  ;;  %v1487_v44 = vsel %vm1044_vm7, 1.0, %v2705_v52  ;;  %v326_v11 = vld [vmem:[%s2000_s15] sm:$0xff] }
  0x9c   : > { %804 = vperm.xlu1 %1592, %v1470_v50   ;;  %v331_v50 = vld [vmem:[%s2000_s15 + $0x28] sm:$0xff] }
  0xa0   : > { %809 = vperm.xlu1 %1592, %v1471_v62  }
  0xa4   : > { %1058 = vperm.xlu1 %1592, %v1487_v44  }
 0x133   : > { %v400_v48 = vpop.f32.mrf.mxu0 }
 0x134   : > { %v488_v56 = vadd.f32 %v400_v48, %v326_v11 }
 0x135   : > { %v402_v46 = vpop.f32.mrf.mxu0 }
 0x136   : > { %v1448_v54 = vmul.f32 -1.442695, %v488_v56  ;;  %v489_v53 = vadd.f32 %v402_v46, %v327_v1  ;;  %v332_v46 = vld [vmem:[%s2000_s15 + $0x30] sm:$0xff]  ;;  %v329_v1 = vld [vmem:[%s2000_s15 + $0x18] sm:$0xff] }
 0x137   : > { %v406_v61 = vpop.f32.mrf.mxu0  ;;  %v477_v62 = vpop.f32.mrf.mxu1 }
 0x138   : > { %1598 = vpow2.f32 %v1448_v54  ;;  %v1449_v57 = vmul.f32 -1.442695, %v489_v53  ;;  %v492_v5 = vadd.f32 %v406_v61, %v330_v58  ;;  %v490_v56 = vadd.f32 %v477_v62, %v328_v59  ;;  %v333_v53 = vld [vmem:[%s2000_s15 + $0x38] sm:$0xff] }
 0x139   : > { %v408_v63 = vpop.f32.mrf.mxu0  ;;  %v479_v48 = vpop.f32.mrf.mxu1 }
 0x13a   : > { %1600 = vpow2.f32 %v1449_v57  ;;  %v1451_v44 = vmul.f32 -1.442695, %v492_v5  ;;  %v493_v8 = vadd.f32 %v408_v63, %v331_v50  ;;  %v1450_v51 = vmul.f32 -1.442695, %v490_v56 }
 0x13b   : > { %v483_v55 = vpop.f32.mrf.mxu1  ;;  %v491_v54 = vadd.f32 %v479_v48, %v329_v1 }
 0x13c   : > { %1602 = vpow2.f32 %v1451_v44  ;;  %v1452_v11 = vmul.f32 -1.442695, %v493_v8  ;;  %v494_v42 = vadd.f32 %v483_v55, %v332_v46 }
 0x13d   : > { %v485_v61 = vpop.f32.mrf.mxu1 }
 0x13e   : > { %1604 = vpow2.f32 %v1452_v11  ;;  %v1453_v40 = vmul.f32 -1.442695, %v494_v42  ;;  %v495_v50 = vadd.f32 %v485_v61, %v333_v53  ;;  %v2329_v42 = vld [vmem:[#allocation3 + $0x8] sm:$0xff] }
 0x13f   : > { %1606 = vpow2.f32 %v1450_v51 }
 0x140   : > { %1608 = vtanh.f32 %v491_v54  ;;  %v2332_v54 = vld [vmem:[#allocation3] sm:$0xff] }
 0x145   : > { %v1599_v58 = vpop.eup %1598 }
 0x146   : > { %v514_v49 = vadd.f32 1.0, %v1599_v58 }
 0x147   : > { %v1601_v57 = vpop.eup %1600 }
 0x148   : > { %1610 = vrcp.f32 %v514_v49  ;;  %v515_v8 = vadd.f32 1.0, %v1601_v57 }
 0x149   : > { %v1603_v5 = vpop.eup %1602  ;;  %1612 = vpow2.f32 %v1453_v40 }
 0x14a   : > { %1614 = vrcp.f32 %v515_v8  ;;  %v517_v59 = vadd.f32 1.0, %v1603_v5 }
 0x14b   : > { %v1605_v62 = vpop.eup %1604  ;;  %1616 = vtanh.f32 %v495_v50 }
 0x14c   : > { %1618 = vrcp.f32 %v517_v59  ;;  %v518_v55 = vadd.f32 1.0, %v1605_v62  ;;  %v1607_v63 = vpop.eup %1606 }
 0x14d   : > { %v1609_v44 = vpop.eup %1608  ;;  %v516_v56 = vadd.f32 1.0, %v1607_v63 }
 0x14e   : > { %1620 = vrcp.f32 %v518_v55  ;;  %v2341_v55 = vpop.permute.xlu0 %555 }
 0x14f   : > { %1622 = vrcp.f32 %v516_v56 }
 0x155   : > { %v1611_v11 = vpop.eup %1610 }
 0x156   : > { %v1613_v51 = vpop.eup %1612  ;;  %v536_v1 = vmul.f32 %v1611_v11, %v1609_v44 }
 0x157   : > { %v1615_v48 = vpop.eup %1614  ;;  %v519_v58 = vadd.f32 1.0, %v1613_v51 }
 0x158   : > { %v1617_v46 = vpop.eup %1616  ;;  %v534_v49 = vmul.f32 %v1615_v48, %v2329_v42 }
 0x159   : > { %v1619_v40 = vpop.eup %1618 }
 0x15a   : > { %v2334_v53 = vadd.f32 %v536_v1, %v534_v49  ;;  %v537_v50 = vmul.f32 %v1619_v40, %v1617_v46  ;;  %v2349_v49 = vpop.permute.xlu0 %560 }
 0x15b   : > { %v1621_v61 = vpop.eup %1620 }
 0x15c   : > { %1624 = vtanh.f32 %v2334_v53  ;;  %v535_v57 = vmul.f32 %v1621_v61, %v2332_v54  ;;  %v1623_v5 = vpop.eup %1622  ;;  %v2721_v61 = vld [vmem:[#allocation29_spill] sm:$0xff] }
 0x15d   : > { %1626 = vrcp.f32 %v519_v58  ;;  %v2722_v58 = vld [vmem:[#allocation21_spill] sm:$0xff] }
 0x15e   : > { %v2338_v8 = vadd.f32 %v537_v50, %v535_v57  ;;  %v2723_v57 = vld [vmem:[#allocation31_spill] sm:$0xff]  ;;  %v2724_v50 = vld [vmem:[#allocation22_spill] sm:$0xff] }
 0x160   : > { %1628 = vtanh.f32 %v2338_v8 }
 0x169   : > { %v1625_v59 = vpop.eup %1624 }
 0x16a   : > { %v542_v62 = vmul.f32 %v1625_v59, %v1623_v5  ;;  %v1627_v63 = vpop.eup %1626  ;;  %v2725_v5 = vld [vmem:[#allocation33_spill] sm:$0xff]  ;;  %v2726_v59 = vld [vmem:[#allocation24_spill] sm:$0xff] }
 0x16c   : > { %v551_v44 = vsub.f32 %v542_v62, %v2196_v0  ;;  %v2727_v62 = vld [vmem:[#allocation35_spill] sm:$0xff] }
 0x16d   : > { %v1629_v11 = vpop.eup %1628 }
 0x16e   : > { %v563_v51 = vmul.f32 %v2341_v55, %v551_v44  ;;  %v543_v48 = vmul.f32 %v1629_v11, %v1627_v63  ;;  %v2728_v63 = vld [vmem:[#allocation26_spill] sm:$0xff]  ;;  %v2729_v44 = vld [vmem:[#allocation37_spill] sm:$0xff]  ;;  %v2730_v11 = vld [vmem:[#allocation28_spill] sm:$0xff] }
 0x170   : > { %v2346_v56 = vadd.f32 %v563_v51, %v2196_v0  ;;  %v552_v46 = vsub.f32 %v543_v48, %v2223_v60  ;;  %v2720_v0 = vld [vmem:[#allocation20_spill] sm:$0xff]  ;;  %v2731_v51 = vld [vmem:[#allocation39_spill] sm:$0xff]  ;;  %v2732_v48 = vld [vmem:[#allocation30_spill] sm:$0xff] }
 0x172   : > { %v564_v1 = vmul.f32 %v2349_v49, %v552_v46  ;;  %647 = vmatmul.mubr.f32.vlgmr.msra.gmra.mxu0 %v2346_v56  ;;  %724 = vmatmul.mubr.f32.vlgmr.msra.gmra.mxu1 %v2346_v56  ;;  %v2733_v46 = vld [vmem:[#allocation40_spill] sm:$0xff] }
 0x173   : > { %652 = vmatprep.mubr.f32.mxu0 %v2705_v52  ;;  %729 = vmatprep.mubr.f32.mxu1 %v2705_v52 }
 0x174   : > { %v2357_v40 = vadd.f32 %v564_v1, %v2223_v60  ;;  %832 = vmatpush1.msra.mxu0 %v2017_v2  ;;  %909 = vmatpush1.msra.mxu1 %v2044_v13  ;;  %v2719_v60 = vld [vmem:[#allocation27_spill] sm:$0xff]  ;;  %v2734_v1 = vld [vmem:[#allocation32_spill] sm:$0xff] }
 0x175   : > { %833 = vmatprep.subr.mxu0 %v2019_v3  ;;  %910 = vmatprep.subr.mxu1 %v2050_v15 }
 0x176   : > { %653 = vmatmul.mubr.f32.gmra.mxu0 %v2357_v40  ;;  %730 = vmatmul.mubr.f32.gmra.mxu1 %v2357_v40 }
 0x177   : > { %834 = vmatpush1.msra.mxu0 %v2022_v4  ;;  %911 = vmatpush1.msra.mxu1 %v2052_v16 }
 0x178   : > { %835 = vmatprep.subr.mxu0 %v2026_v6  ;;  %912 = vmatprep.subr.mxu1 %v2058_v18 }
 0x179   : > { %836 = vmatpush1.msra.mxu0 %v2030_v7  ;;  %913 = vmatpush1.msra.mxu1 %v2064_v20 }
 0x17a   : > { %837 = vmatprep.subr.mxu0 %v2033_v9  ;;  %914 = vmatprep.subr.mxu1 %v2066_v21 }
 0x17b   : > { %838 = vmatpush1.msra.mxu0 %v2036_v10  ;;  %915 = vmatpush1.msra.mxu1 %v2072_v23 }
 0x17c   : > { %839 = vmatprep.subr.mxu0 %v2041_v12  ;;  %916 = vmatprep.subr.mxu1 %v2078_v25 }
 0x17d   : > { %840 = vmatpush1.msra.mxu0 %v2047_v14  ;;  %917 = vmatpush1.msra.mxu1 %v2084_v27 }
 0x17e   : > { %841 = vmatprep.subr.mxu0 %v2055_v17  ;;  %918 = vmatprep.subr.mxu1 %v2090_v29 }
 0x17f   : > { %842 = vmatpush1.msra.mxu0 %v2061_v19  ;;  %919 = vmatpush1.msra.mxu1 %v2096_v31 }
 0x180   : > { %843 = vmatprep.subr.mxu0 %v2069_v22  ;;  %920 = vmatprep.subr.mxu1 %v2102_v33 }
 0x181   : > { %844 = vmatpush1.msra.mxu0 %v2075_v24  ;;  %921 = vmatpush1.msra.mxu1 %v2108_v35 }
 0x182   : > { %845 = vmatprep.subr.mxu0 %v2081_v26  ;;  %922 = vmatprep.subr.mxu1 %v2114_v37 }
 0x183   : > { %846 = vmatpush1.msra.mxu0 %v2087_v28  ;;  %923 = vmatpush1.msra.mxu1 %v2120_v39 }
 0x184   : > { %847 = vmatprep.subr.mxu0 %v2093_v30  ;;  %924 = vmatprep.subr.mxu1 %v2126_v41 }
 0x185   : > { %848 = vmatpush1.msra.mxu0 %v2099_v32  ;;  %925 = vmatpush1.msra.mxu1 %v2132_v43 }
 0x186   : > { %849 = vmatprep.subr.mxu0 %v2105_v34  ;;  %926 = vmatprep.subr.mxu1 %v2138_v45 }
 0x187   : > { %850 = vmatpush1.msra.mxu0 %v2111_v36  ;;  %927 = vmatpush1.msra.mxu1 %v2144_v47 }
 0x188   : > { %851 = vmatprep.subr.mxu0 %v2117_v38  ;;  %928 = vmatprep.subr.mxu1 %v2719_v60  ;;  %v1458_v38 = vld [vmem:[%s2000_s15 + $0x50] sm:$0xff] }
 0x189   : > { %852 = vmatpush1.msra.mxu0 %v2720_v0  ;;  %929 = vmatpush1.msra.mxu1 %v2721_v61 }
 0x18a   : > { %853 = vmatprep.subr.mxu0 %v2722_v58  ;;  %930 = vmatprep.subr.mxu1 %v2723_v57  ;;  %v1461_v58 = vld [vmem:[%s2000_s15 + $0x68] sm:$0xff] }
 0x18b   : > { %854 = vmatpush1.msra.mxu0 %v2724_v50  ;;  %931 = vmatpush1.msra.mxu1 %v2725_v5  ;;  %v2735_v5 = vld [vmem:[#allocation41_spill] sm:$0xff] }
 0x18c   : > { %855 = vmatprep.subr.mxu0 %v2726_v59  ;;  %932 = vmatprep.subr.mxu1 %v2727_v62  ;;  %v2736_v59 = vld [vmem:[#allocation34_spill] sm:$0xff] }
 0x18d   : > { %856 = vmatpush1.msra.mxu0 %v2728_v63  ;;  %933 = vmatpush1.msra.mxu1 %v2729_v44  ;;  %v2737_v63 = vld [vmem:[#allocation42_spill] sm:$0xff]  ;;  %v2738_v44 = vld [vmem:[#allocation36_spill] sm:$0xff] }
 0x18e   : > { %857 = vmatprep.subr.mxu0 %v2730_v11  ;;  %934 = vmatprep.subr.mxu1 %v2731_v51  ;;  %v2739_v11 = vld [vmem:[#allocation43_spill] sm:$0xff]  ;;  %v2740_v62 = vld [vmem:[#allocation38_spill] sm:$0xff] }
 0x18f   : > { %858 = vmatpush1.msra.mxu0 %v2732_v48  ;;  %935 = vmatpush1.msra.mxu1 %v2733_v46  ;;  %v2741_v48 = vld [vmem:[#allocation44_spill] sm:$0xff] }
 0x190   : > { %859 = vmatprep.subr.mxu0 %v2734_v1  ;;  %936 = vmatprep.subr.mxu1 %v2735_v5  ;;  %v2742_v1 = vld [vmem:[#allocation15_spill] sm:$0xff]  ;;  %v2743_v5 = vld [vmem:[#allocation16_spill] sm:$0xff] }
 0x191   : > { %860 = vmatpush1.msra.mxu0 %v2736_v59  ;;  %937 = vmatpush1.msra.mxu1 %v2737_v63  ;;  %v1456_v59 = vld [vmem:[%s2000_s15 + $0x40] sm:$0xff]  ;;  %v1457_v63 = vld [vmem:[%s2000_s15 + $0x48] sm:$0xff] }
 0x192   : > { %861 = vmatprep.subr.mxu0 %v2738_v44  ;;  %938 = vmatprep.subr.mxu1 %v2739_v11  ;;  %v1460_v11 = vld [vmem:[%s2000_s15 + $0x60] sm:$0xff] }
 0x193   : > { %862 = vmatpush1.msra.mxu0 %v2740_v62  ;;  %895 = vmatprep.mubr.f32.mxu0 %v2705_v52 }
 0x194   : > { %939 = vmatpush1.msra.mxu1 %v2741_v48  ;;  %972 = vmatprep.mubr.f32.mxu1 %v2705_v52 }
 0x195   : > { %1080 = vmatprep.subr.mxu0 %v2742_v1  ;;  %1157 = vmatprep.subr.mxu1 %v2743_v5 }
 0x232   : > { %v648_v46 = vpop.f32.mrf.mxu0  ;;  %v725_v48 = vpop.f32.mrf.mxu1 }
 0x233   : > { %v736_v44 = vadd.f32 %v1456_v59, %v648_v46  ;;  %v1459_v46 = vld [vmem:[%s2000_s15 + $0x58] sm:$0xff] }
 0x234   : > { %v650_v51 = vpop.f32.mrf.mxu0  ;;  %v727_v47 = vpop.f32.mrf.mxu1 }
 0x235   : > { %v1464_v50 = vmul.f32 -1.442695, %v736_v44  ;;  %v737_v57 = vadd.f32 %v1457_v63, %v650_v51  ;;  %v738_v44 = vadd.f32 %v1458_v38, %v725_v48  ;;  %v1462_v63 = vld [vmem:[%s2000_s15 + $0x70] sm:$0xff]  ;;  %v739_v34 = vadd.f32 %v1459_v46, %v727_v47 }
 0x236   : > { %v654_v62 = vpop.f32.mrf.mxu0  ;;  %v731_v51 = vpop.f32.mrf.mxu1 }
 0x237   : > { %1630 = vpow2.f32 %v1464_v50  ;;  %v1465_v61 = vmul.f32 -1.442695, %v737_v57  ;;  %v740_v0 = vadd.f32 %v1460_v11, %v654_v62  ;;  %v1466_v36 = vmul.f32 -1.442695, %v738_v44  ;;  %v1463_v62 = vld [vmem:[%s2000_s15 + $0x78] sm:$0xff] }
 0x238   : > { %v656_v1 = vpop.f32.mrf.mxu0  ;;  %v742_v50 = vadd.f32 %v1462_v63, %v731_v51  ;;  %v733_v11 = vpop.f32.mrf.mxu1 }
 0x239   : > { %1632 = vpow2.f32 %v1465_v61  ;;  %v1467_v5 = vmul.f32 -1.442695, %v740_v0  ;;  %v741_v60 = vadd.f32 %v1461_v58, %v656_v1 }
 0x23a   : > { %v1469_v0 = vmul.f32 -1.442695, %v742_v50 }
 0x23b   : > { %1634 = vpow2.f32 %v1467_v5  ;;  %v1468_v59 = vmul.f32 -1.442695, %v741_v60  ;;  %v743_v60 = vadd.f32 %v1463_v62, %v733_v11 }
 0x23d   : > { %1636 = vpow2.f32 %v1468_v59 }
 0x23e   : > { %1638 = vpow2.f32 %v1466_v36  ;;  %v568_v36 = vsub.f32 %v2338_v8, %v2332_v54 }
 0x240   : > { %v570_v51 = vmul.f32 %v568_v36, %v2349_v49 }
 0x244   : > { %v1631_v45 = vpop.eup %1630 }
 0x245   : > { %v762_v57 = vadd.f32 1.0, %v1631_v45  ;;  %v567_v45 = vsub.f32 %v2334_v53, %v2329_v42  ;;  %v805_v53 = vpop.permute.xlu1 %804 }
 0x246   : > { %v1633_v61 = vpop.eup %1632 }
 0x247   : > { %1640 = vrcp.f32 %v762_v57  ;;  %v763_v58 = vadd.f32 1.0, %v1633_v61  ;;  %v569_v47 = vmul.f32 %v567_v45, %v2341_v55  ;;  %v572_v55 = vadd.f32 %v570_v51, %v2332_v54 }
 0x248   : > { %v1635_v1 = vpop.eup %1634  ;;  %1642 = vtanh.f32 %v739_v34 }
 0x249   : > { %1644 = vrcp.f32 %v763_v58  ;;  %v765_v38 = vadd.f32 1.0, %v1635_v1  ;;  %v571_v63 = vadd.f32 %v569_v47, %v2329_v42 }
 0x24a   : > { %v1637_v48 = vpop.eup %1636  ;;  %1646 = vpow2.f32 %v1469_v0 }
 0x24b   : > { %1648 = vrcp.f32 %v765_v38  ;;  %v766_v5 = vadd.f32 1.0, %v1637_v48  ;;  %v1639_v59 = vpop.eup %1638 }
 0x24c   : > { %1650 = vtanh.f32 %v743_v60  ;;  %v764_v50 = vadd.f32 1.0, %v1639_v59 }
 0x24d   : > { %1652 = vrcp.f32 %v766_v5  ;;  %v810_v5 = vpop.permute.xlu1 %809 }
 0x24e   : > { %1654 = vrcp.f32 %v764_v50 }
 0x254   : > { %v1641_v44 = vpop.eup %1640 }
 0x255   : > { %v1643_v34 = vpop.eup %1642 }
 0x256   : > { %v1645_v46 = vpop.eup %1644  ;;  %v784_v11 = vmul.f32 %v1643_v34, %v1641_v44 }
 0x257   : > { %v1647_v57 = vpop.eup %1646  ;;  %v782_v62 = vmul.f32 %v1645_v46, %v571_v63 }
 0x258   : > { %v1649_v61 = vpop.eup %1648  ;;  %v767_v8 = vadd.f32 1.0, %v1647_v57 }
 0x259   : > { %v1651_v0 = vpop.eup %1650  ;;  %v786_v58 = vadd.f32 %v784_v11, %v782_v62 }
 0x25a   : > { %v1653_v1 = vpop.eup %1652  ;;  %v785_v42 = vmul.f32 %v1651_v0, %v1649_v61 }
 0x25b   : > { %1656 = vtanh.f32 %v786_v58  ;;  %v816_v60 = vsub.f32 %v786_v58, %v571_v63  ;;  %v783_v38 = vmul.f32 %v1653_v1, %v572_v55  ;;  %v1655_v54 = vpop.eup %1654 }
 0x25c   : > { %1658 = vrcp.f32 %v767_v8 }
 0x25d   : > { %v818_v48 = vmul.f32 %v816_v60, %v805_v53  ;;  %v787_v49 = vadd.f32 %v785_v42, %v783_v38 }
 0x25f   : > { %v2443_v45 = vadd.f32 %v818_v48, %v571_v63  ;;  %1660 = vtanh.f32 %v787_v49  ;;  %v817_v47 = vsub.f32 %v787_v49, %v572_v55  ;;  %v1474_v48 = vld [vmem:[%s2000_s15 + $0x90] sm:$0xff] }
 0x261   : > { %v819_v36 = vmul.f32 %v817_v47, %v810_v5 }
 0x263   : > { %v2445_v59 = vadd.f32 %v819_v36, %v572_v55  ;;  %v1477_v55 = vld [vmem:[%s2000_s15 + $0xa8] sm:$0xff]  ;;  %v1478_v36 = vld [vmem:[%s2000_s15 + $0xb0] sm:$0xff] }
 0x268   : > { %v1657_v44 = vpop.eup %1656 }
 0x269   : > { %v790_v34 = vmul.f32 %v1657_v44, %v1655_v54  ;;  %v1659_v51 = vpop.eup %1658  ;;  %v1475_v44 = vld [vmem:[%s2000_s15 + $0x98] sm:$0xff] }
 0x26b   : > { %v800_v46 = vsub.f32 %v790_v34, %v2346_v56 }
 0x26c   : > { %v1661_v50 = vpop.eup %1660 }
 0x26d   : > { %v812_v57 = vmul.f32 %v805_v53, %v800_v46  ;;  %v791_v62 = vmul.f32 %v1661_v50, %v1659_v51 }
 0x26f   : > { %v2449_v11 = vadd.f32 %v812_v57, %v2346_v56  ;;  %v801_v63 = vsub.f32 %v791_v62, %v2357_v40  ;;  %v1479_v62 = vld [vmem:[%s2000_s15 + $0xb8] sm:$0xff] }
 0x271   : > { %v813_v61 = vmul.f32 %v810_v5, %v801_v63  ;;  %896 = vmatmul.mubr.f32.vlgmr.msra.gmra.mxu0 %v2449_v11  ;;  %973 = vmatmul.mubr.f32.vlgmr.msra.gmra.mxu1 %v2449_v11 }
 0x272   : > { %901 = vmatprep.mubr.f32.mxu0 %v2705_v52  ;;  %978 = vmatprep.mubr.f32.mxu1 %v2705_v52 }
 0x273   : > { %v2457_v0 = vadd.f32 %v813_v61, %v2357_v40  ;;  %1081 = vmatpush1.msra.mxu0 %v2017_v2  ;;  %1158 = vmatpush1.msra.mxu1 %v2044_v13  ;;  %v2744_v2 = vld [vmem:[#allocation17_spill] sm:$0xff] }
 0x274   : > { %1082 = vmatprep.subr.mxu0 %v2019_v3  ;;  %1159 = vmatprep.subr.mxu1 %v2050_v15  ;;  %v2745_v3 = vld [vmem:[#allocation23_spill] sm:$0xff]  ;;  %v2752_v13 = vld [vmem:[#allocation21_spill] sm:$0xff]  ;;  %v2754_v15 = vld [vmem:[#allocation22_spill] sm:$0xff] }
 0x275   : > { %902 = vmatmul.mubr.f32.gmra.mxu0 %v2457_v0  ;;  %979 = vmatmul.mubr.f32.gmra.mxu1 %v2457_v0 }
 0x276   : > { %1083 = vmatpush1.msra.mxu0 %v2022_v4  ;;  %1160 = vmatpush1.msra.mxu1 %v2052_v16  ;;  %v2746_v4 = vld [vmem:[#allocation18_spill] sm:$0xff]  ;;  %v2755_v16 = vld [vmem:[#allocation33_spill] sm:$0xff] }
 0x277   : > { %1084 = vmatprep.subr.mxu0 %v2026_v6  ;;  %1161 = vmatprep.subr.mxu1 %v2058_v18  ;;  %v2747_v6 = vld [vmem:[#allocation25_spill] sm:$0xff]  ;;  %v2757_v18 = vld [vmem:[#allocation35_spill] sm:$0xff] }
 0x278   : > { %1085 = vmatpush1.msra.mxu0 %v2030_v7  ;;  %1162 = vmatpush1.msra.mxu1 %v2064_v20  ;;  %v2748_v7 = vld [vmem:[#allocation19_spill] sm:$0xff]  ;;  %v2759_v20 = vld [vmem:[#allocation37_spill] sm:$0xff] }
 0x279   : > { %1086 = vmatprep.subr.mxu0 %v2033_v9  ;;  %1163 = vmatprep.subr.mxu1 %v2066_v21  ;;  %v2749_v9 = vld [vmem:[#allocation27_spill] sm:$0xff]  ;;  %v2760_v21 = vld [vmem:[#allocation28_spill] sm:$0xff] }
 0x27a   : > { %1087 = vmatpush1.msra.mxu0 %v2036_v10  ;;  %1164 = vmatpush1.msra.mxu1 %v2072_v23  ;;  %v2750_v10 = vld [vmem:[#allocation20_spill] sm:$0xff]  ;;  %v2762_v23 = vld [vmem:[#allocation30_spill] sm:$0xff] }
 0x27b   : > { %1088 = vmatprep.subr.mxu0 %v2041_v12  ;;  %1165 = vmatprep.subr.mxu1 %v2078_v25  ;;  %v2751_v12 = vld [vmem:[#allocation29_spill] sm:$0xff]  ;;  %v2764_v25 = vld [vmem:[#allocation32_spill] sm:$0xff] }
 0x27c   : > { %1089 = vmatpush1.msra.mxu0 %v2047_v14  ;;  %1166 = vmatpush1.msra.mxu1 %v2084_v27  ;;  %v2753_v14 = vld [vmem:[#allocation31_spill] sm:$0xff]  ;;  %v2766_v27 = vld [vmem:[#allocation34_spill] sm:$0xff] }
 0x27d   : > { %1090 = vmatprep.subr.mxu0 %v2055_v17  ;;  %1167 = vmatprep.subr.mxu1 %v2090_v29  ;;  %v2756_v17 = vld [vmem:[#allocation24_spill] sm:$0xff] }
 0x27e   : > { %1091 = vmatpush1.msra.mxu0 %v2061_v19  ;;  %1168 = vmatpush1.msra.mxu1 %v2096_v31  ;;  %v2758_v19 = vld [vmem:[#allocation26_spill] sm:$0xff]  ;;  %v2768_v29 = vld [vmem:[#allocation36_spill] sm:$0xff] }
 0x27f   : > { %1092 = vmatprep.subr.mxu0 %v2069_v22  ;;  %1169 = vmatprep.subr.mxu1 %v2102_v33  ;;  %v2761_v22 = vld [vmem:[#allocation39_spill] sm:$0xff]  ;;  %v2770_v31 = vld [vmem:[#allocation38_spill] sm:$0xff]  ;;  %v1472_v33 = vld [vmem:[%s2000_s15 + $0x80] sm:$0xff] }
 0x280   : > { %1093 = vmatpush1.msra.mxu0 %v2075_v24  ;;  %1170 = vmatpush1.msra.mxu1 %v2108_v35  ;;  %v2763_v24 = vld [vmem:[#allocation40_spill] sm:$0xff] }
 0x281   : > { %1094 = vmatprep.subr.mxu0 %v2081_v26  ;;  %1171 = vmatprep.subr.mxu1 %v2114_v37  ;;  %v2765_v26 = vld [vmem:[#allocation41_spill] sm:$0xff]  ;;  %v1473_v37 = vld [vmem:[%s2000_s15 + $0x88] sm:$0xff] }
 0x282   : > { %1095 = vmatpush1.msra.mxu0 %v2087_v28  ;;  %1172 = vmatpush1.msra.mxu1 %v2120_v39  ;;  %v2767_v28 = vld [vmem:[#allocation42_spill] sm:$0xff] }
 0x283   : > { %1096 = vmatprep.subr.mxu0 %v2093_v30  ;;  %1173 = vmatprep.subr.mxu1 %v2126_v41  ;;  %v2769_v30 = vld [vmem:[#allocation43_spill] sm:$0xff] }
 0x284   : > { %1097 = vmatpush1.msra.mxu0 %v2099_v32  ;;  %1174 = vmatpush1.msra.mxu1 %v2132_v43  ;;  %v2771_v32 = vld [vmem:[#allocation44_spill] sm:$0xff]  ;;  %v1476_v43 = vld [vmem:[%s2000_s15 + $0xa0] sm:$0xff] }
 0x285   : > { %1098 = vmatprep.subr.mxu0 %v2744_v2  ;;  %1175 = vmatprep.subr.mxu1 %v2745_v3 }
 0x286   : > { %1099 = vmatpush1.msra.mxu0 %v2746_v4  ;;  %1176 = vmatpush1.msra.mxu1 %v2747_v6 }
 0x287   : > { %1100 = vmatprep.subr.mxu0 %v2748_v7  ;;  %1177 = vmatprep.subr.mxu1 %v2749_v9 }
 0x288   : > { %1101 = vmatpush1.msra.mxu0 %v2750_v10  ;;  %1178 = vmatpush1.msra.mxu1 %v2751_v12 }
 0x289   : > { %1102 = vmatprep.subr.mxu0 %v2752_v13  ;;  %1179 = vmatprep.subr.mxu1 %v2753_v14 }
 0x28a   : > { %1103 = vmatpush1.msra.mxu0 %v2754_v15  ;;  %1180 = vmatpush1.msra.mxu1 %v2755_v16 }
 0x28b   : > { %1104 = vmatprep.subr.mxu0 %v2756_v17  ;;  %1181 = vmatprep.subr.mxu1 %v2757_v18 }
 0x28c   : > { %1105 = vmatpush1.msra.mxu0 %v2758_v19  ;;  %1182 = vmatpush1.msra.mxu1 %v2759_v20 }
 0x28d   : > { %1106 = vmatprep.subr.mxu0 %v2760_v21  ;;  %1183 = vmatprep.subr.mxu1 %v2761_v22 }
 0x28e   : > { %1107 = vmatpush1.msra.mxu0 %v2762_v23  ;;  %1184 = vmatpush1.msra.mxu1 %v2763_v24 }
 0x28f   : > { %1108 = vmatprep.subr.mxu0 %v2764_v25  ;;  %1185 = vmatprep.subr.mxu1 %v2765_v26 }
 0x290   : > { %1109 = vmatpush1.msra.mxu0 %v2766_v27  ;;  %1186 = vmatpush1.msra.mxu1 %v2767_v28  ;;  %v1054_v28 = vpop.permute.xlu0 %1053 }
 0x291   : > { %1110 = vmatprep.subr.mxu0 %v2768_v29  ;;  %1187 = vmatprep.subr.mxu1 %v2769_v30 }
 0x292   : > { %1111 = vmatpush1.msra.mxu0 %v2770_v31  ;;  %1144 = vmatprep.mubr.f32.mxu0 %v2705_v52 }
 0x293   : > { %1188 = vmatpush1.msra.mxu1 %v2771_v32  ;;  %1221 = vmatprep.mubr.f32.mxu1 %v2705_v52 }
 0x331   : > { %v897_v35 = vpop.f32.mrf.mxu0  ;;  %v974_v58 = vpop.f32.mrf.mxu1 }
 0x332   : > { %v985_v39 = vadd.f32 %v1472_v33, %v897_v35  ;;  %v987_v47 = vadd.f32 %v1474_v48, %v974_v58  ;;  %v1059_v33 = vpop.permute.xlu1 %1058 }
 0x333   : > { %v899_v41 = vpop.f32.mrf.mxu0  ;;  %v976_v49 = vpop.f32.mrf.mxu1 }
 0x334   : > { %v1480_v56 = vmul.f32 -1.442695, %v985_v39  ;;  %v986_v40 = vadd.f32 %v1473_v37, %v899_v41  ;;  %v1482_v34 = vmul.f32 -1.442695, %v987_v47  ;;  %v988_v50 = vadd.f32 %v1475_v44, %v976_v49  ;;  %v1492_v49 = vld [vmem:[%s2000_s15 + $0xe0] sm:$0xff] }
 0x335   : > { %v903_v53 = vpop.f32.mrf.mxu0  ;;  %v980_v54 = vpop.f32.mrf.mxu1 }
 0x336   : > { %1662 = vpow2.f32 %v1480_v56  ;;  %v1481_v1 = vmul.f32 -1.442695, %v986_v40  ;;  %v989_v8 = vadd.f32 %v1476_v43, %v903_v53  ;;  %v991_v51 = vadd.f32 %v1478_v36, %v980_v54  ;;  %v1493_v54 = vld [vmem:[%s2000_s15 + $0xe8] sm:$0xff] }
 0x337   : > { %v905_v60 = vpop.f32.mrf.mxu0  ;;  %v982_v63 = vpop.f32.mrf.mxu1 }
 0x338   : > { %1664 = vpow2.f32 %v1481_v1  ;;  %v1483_v38 = vmul.f32 -1.442695, %v989_v8  ;;  %v990_v42 = vadd.f32 %v1477_v55, %v905_v60  ;;  %v1485_v2 = vmul.f32 -1.442695, %v991_v51 }
 0x339   : > { %v992_v6 = vadd.f32 %v1479_v62, %v982_v63 }
 0x33a   : > { %1666 = vpow2.f32 %v1483_v38  ;;  %v1484_v5 = vmul.f32 -1.442695, %v990_v42  ;;  %v1489_v38 = vld [vmem:[%s2000_s15 + $0xc8] sm:$0xff] }
 0x33c   : > { %1668 = vpow2.f32 %v1484_v5 }
 0x33d   : > { %1670 = vpow2.f32 %v1482_v34 }
 0x343   : > { %v1663_v46 = vpop.eup %1662 }
 0x344   : > { %v1011_v57 = vadd.f32 1.0, %v1663_v46 }
 0x345   : > { %v1665_v61 = vpop.eup %1664 }
 0x346   : > { %1672 = vrcp.f32 %v1011_v57  ;;  %v1012_v3 = vadd.f32 1.0, %v1665_v61  ;;  %v1494_v61 = vld [vmem:[%s2000_s15 + $0xf0] sm:$0xff] }
 0x347   : > { %v1667_v4 = vpop.eup %1666  ;;  %1674 = vtanh.f32 %v988_v50  ;;  %v1490_v50 = vld [vmem:[%s2000_s15 + $0xd0] sm:$0xff] }
 0x348   : > { %1676 = vrcp.f32 %v1012_v3  ;;  %v1014_v7 = vadd.f32 1.0, %v1667_v4  ;;  %v1491_v3 = vld [vmem:[%s2000_s15 + $0xd8] sm:$0xff] }
 0x349   : > { %v1669_v9 = vpop.eup %1668  ;;  %1678 = vpow2.f32 %v1485_v2 }
 0x34a   : > { %1680 = vrcp.f32 %v1014_v7  ;;  %v1015_v10 = vadd.f32 1.0, %v1669_v9  ;;  %v1671_v12 = vpop.eup %1670 }
 0x34b   : > { %1682 = vtanh.f32 %v992_v6  ;;  %v1013_v16 = vadd.f32 1.0, %v1671_v12  ;;  %v1495_v12 = vld [vmem:[%s2000_s15 + $0xf8] sm:$0xff] }
 0x34c   : > { %1684 = vrcp.f32 %v1015_v10 }
 0x34d   : > { %1686 = vrcp.f32 %v1013_v16 }
 0x353   : > { %v1673_v13 = vpop.eup %1672 }
 0x354   : > { %v1675_v14 = vpop.eup %1674 }
 0x355   : > { %v1677_v15 = vpop.eup %1676  ;;  %v1033_v19 = vmul.f32 %v1675_v14, %v1673_v13 }
 0x356   : > { %v1679_v17 = vpop.eup %1678  ;;  %v1031_v18 = vmul.f32 %v1677_v15, %v2443_v45 }
 0x357   : > { %v1681_v20 = vpop.eup %1680  ;;  %v1016_v24 = vadd.f32 1.0, %v1679_v17 }
 0x358   : > { %v1683_v21 = vpop.eup %1682  ;;  %v1035_v22 = vadd.f32 %v1033_v19, %v1031_v18 }
 0x359   : > { %v1685_v23 = vpop.eup %1684  ;;  %v1034_v27 = vmul.f32 %v1683_v21, %v1681_v20 }
 0x35a   : > { %1688 = vtanh.f32 %v1035_v22  ;;  %v1065_v25 = vsub.f32 %v1035_v22, %v2443_v45  ;;  %v1032_v26 = vmul.f32 %v1685_v23, %v2445_v59  ;;  %v1687_v39 = vpop.eup %1686 }
 0x35b   : > { %1690 = vrcp.f32 %v1016_v24 }
 0x35c   : > { %v1067_v29 = vmul.f32 %v1065_v25, %v1054_v28  ;;  %v1036_v30 = vadd.f32 %v1034_v27, %v1032_v26 }
 0x35e   : > { %v2537_v31 = vadd.f32 %v1067_v29, %v2443_v45  ;;  %1692 = vtanh.f32 %v1036_v30  ;;  %v1066_v32 = vsub.f32 %v1036_v30, %v2445_v59 }
 0x360   : > { %v1068_v35 = vmul.f32 %v1066_v32, %v1059_v33 }
 0x362   : > { %v2541_v37 = vadd.f32 %v1068_v35, %v2445_v59 }
 0x367   : > { %v1689_v41 = vpop.eup %1688 }
 0x368   : > { %v1039_v43 = vmul.f32 %v1689_v41, %v1687_v39  ;;  %v1691_v56 = vpop.eup %1690 }
 0x36a   : > { %v1049_v40 = vsub.f32 %v1039_v43, %v2449_v11 }
 0x36b   : > { %v1693_v53 = vpop.eup %1692 }
 0x36c   : > { %v1061_v55 = vmul.f32 %v1054_v28, %v1049_v40  ;;  %v1040_v45 = vmul.f32 %v1693_v53, %v1691_v56  ;;  %v1595_v28 = vpop.permute.xlu0 %1594 }
 0x36d   : > { %v1596_v41 = vunpack.i.l.bf16 %v1595_v28 }
 0x36e   : > { %v2545_v58 = vadd.f32 %v1061_v55, %v2449_v11  ;;  %v1050_v1 = vsub.f32 %v1040_v45, %v2457_v0  ;;  %v1488_v11 = vld [vmem:[%s2000_s15 + $0xc0] sm:$0xff] }
 0x370   : > { %1145 = vmatmul.mubr.f32.vlgmr.msra.gmra.mxu0 %v2545_v58  ;;  %1222 = vmatmul.mubr.f32.vlgmr.msra.gmra.mxu1 %v2545_v58  ;;  %v1062_v59 = vmul.f32 %v1059_v33, %v1050_v1  ;;  %v1597_v1 = vunpack.i.h.bf16 %v1595_v28 }
 0x371   : > { %1150 = vmatprep.mubr.f32.mxu0 %v2705_v52  ;;  %1227 = vmatprep.mubr.f32.mxu1 %v2705_v52 }
 0x372   : > { %v2553_v8 = vadd.f32 %v1062_v59, %v2457_v0 }
 0x374   : > { %1151 = vmatmul.mubr.f32.gmra.mxu0 %v2553_v8  ;;  %1228 = vmatmul.mubr.f32.gmra.mxu1 %v2553_v8 }
 0x430   : > { %v1146_v60 = vpop.f32.mrf.mxu0  ;;  %v1223_v52 = vpop.f32.mrf.mxu1 }
 0x431   : > { %v1234_v42 = vadd.f32 %v1488_v11, %v1146_v60  ;;  %v1236_v63 = vadd.f32 %v1490_v50, %v1223_v52 }
 0x432   : > { %v1148_v48 = vpop.f32.mrf.mxu0  ;;  %v1225_v57 = vpop.f32.mrf.mxu1 }
 0x433   : > { %v1496_v5 = vmul.f32 -1.442695, %v1234_v42  ;;  %v1235_v47 = vadd.f32 %v1489_v38, %v1148_v48  ;;  %v1498_v4 = vmul.f32 -1.442695, %v1236_v63  ;;  %v1237_v9 = vadd.f32 %v1491_v3, %v1225_v57 }
 0x434   : > { %v1152_v36 = vpop.f32.mrf.mxu0  ;;  %v1229_v2 = vpop.f32.mrf.mxu1 }
 0x435   : > { %1694 = vpow2.f32 %v1496_v5  ;;  %v1497_v0 = vmul.f32 -1.442695, %v1235_v47  ;;  %v1238_v44 = vadd.f32 %v1492_v49, %v1152_v36  ;;  %v1240_v6 = vadd.f32 %v1494_v61, %v1229_v2 }
 0x436   : > { %v1154_v34 = vpop.f32.mrf.mxu0  ;;  %v1231_v13 = vpop.f32.mrf.mxu1 }
 0x437   : > { %1696 = vpow2.f32 %v1497_v0  ;;  %v1499_v51 = vmul.f32 -1.442695, %v1238_v44  ;;  %v1239_v46 = vadd.f32 %v1493_v54, %v1154_v34  ;;  %v1501_v15 = vmul.f32 -1.442695, %v1240_v6 }
 0x438   : > { %v1241_v18 = vadd.f32 %v1495_v12, %v1231_v13 }
 0x439   : > { %1698 = vpow2.f32 %v1499_v51  ;;  %v1500_v62 = vmul.f32 -1.442695, %v1239_v46 }
 0x43b   : > { %1700 = vpow2.f32 %v1500_v62 }
 0x43c   : > { %1702 = vpow2.f32 %v1498_v4 }
 0x442   : > { %v1695_v7 = vpop.eup %1694 }
 0x443   : > { %v1260_v10 = vadd.f32 1.0, %v1695_v7 }
 0x444   : > { %v1697_v14 = vpop.eup %1696 }
 0x445   : > { %1704 = vrcp.f32 %v1260_v10  ;;  %v1261_v16 = vadd.f32 1.0, %v1697_v14 }
 0x446   : > { %v1699_v17 = vpop.eup %1698  ;;  %1706 = vtanh.f32 %v1237_v9 }
 0x447   : > { %1708 = vrcp.f32 %v1261_v16  ;;  %v1263_v19 = vadd.f32 1.0, %v1699_v17 }
 0x448   : > { %v1701_v20 = vpop.eup %1700  ;;  %1710 = vpow2.f32 %v1501_v15 }
 0x449   : > { %1712 = vrcp.f32 %v1263_v19  ;;  %v1264_v21 = vadd.f32 1.0, %v1701_v20  ;;  %v1703_v22 = vpop.eup %1702 }
 0x44a   : > { %1714 = vtanh.f32 %v1241_v18  ;;  %v1262_v26 = vadd.f32 1.0, %v1703_v22 }
 0x44b   : > { %1716 = vrcp.f32 %v1264_v21 }
 0x44c   : > { %1718 = vrcp.f32 %v1262_v26 }
 0x452   : > { %v1705_v23 = vpop.eup %1704 }
 0x453   : > { %v1707_v24 = vpop.eup %1706 }
 0x454   : > { %v1709_v25 = vpop.eup %1708  ;;  %v1282_v30 = vmul.f32 %v1707_v24, %v1705_v23 }
 0x455   : > { %v1711_v27 = vpop.eup %1710  ;;  %v1280_v29 = vmul.f32 %v1709_v25, %v2537_v31 }
 0x456   : > { %v1713_v32 = vpop.eup %1712  ;;  %v1265_v43 = vadd.f32 1.0, %v1711_v27 }
 0x457   : > { %v1715_v33 = vpop.eup %1714  ;;  %v1284_v35 = vadd.f32 %v1282_v30, %v1280_v29 }
 0x458   : > { %v1717_v39 = vpop.eup %1716  ;;  %v1283_v53 = vmul.f32 %v1715_v33, %v1713_v32 }
 0x459   : > { %1720 = vtanh.f32 %v1284_v35  ;;  %v1314_v56 = vsub.f32 %v1284_v35, %v2537_v31  ;;  %v1281_v40 = vmul.f32 %v1717_v39, %v2541_v37  ;;  %v1719_v42 = vpop.eup %1718 }
 0x45a   : > { %1722 = vrcp.f32 %v1265_v43 }
 0x45b   : > { %v1316_v55 = vmul.f32 %v1596_v41, %v1314_v56  ;;  %v1285_v45 = vadd.f32 %v1283_v53, %v1281_v40 }
 0x45d   : > { %v1318_v59 = vadd.f32 %v1316_v55, %v2537_v31  ;;  %1724 = vtanh.f32 %v1285_v45  ;;  %v1315_v11 = vsub.f32 %v1285_v45, %v2541_v37 }
 0x45f   : > { %1322 = vst [vmem:[#allocation3 + $0x8] sm:$0xff] %v1318_v59  ;;  %v1317_v60 = vmul.f32 %v1597_v1, %v1315_v11 }
 0x461   : > { %v1319_v38 = vadd.f32 %v1317_v60, %v2541_v37 }
 0x463   : > { %1323 = vst [vmem:[#allocation3] sm:$0xff] %v1319_v38 }
 0x466   : > { %v1721_v48 = vpop.eup %1720 }
 0x467   : > { %v1288_v49 = vmul.f32 %v1721_v48, %v1719_v42  ;;  %v1723_v5 = vpop.eup %1722 }
 0x469   : > { %v1298_v47 = vsub.f32 %v1288_v49, %v2545_v58 }
 0x46a   : > { %v1725_v36 = vpop.eup %1724 }
 0x46b   : > { %v1310_v54 = vmul.f32 %v1596_v41, %v1298_v47  ;;  %v1289_v52 = vmul.f32 %v1725_v36, %v1723_v5 }
 0x46d   : > { %v1312_v0 = vadd.f32 %v1310_v54, %v2545_v58  ;;  %v1299_v31 = vsub.f32 %v1289_v52, %v2553_v8 }
 0x46f   : > { %1320 = vst [vmem:[#allocation2] sm:$0xff] %v1312_v0  ;;  %v1311_v44 = vmul.f32 %v1597_v1, %v1299_v31 }
 0x471   : > { %v1313_v34 = vadd.f32 %v1311_v44, %v2553_v8 }
 0x473   : > { %1321 = vst [vmem:[#allocation2 + $0x8] sm:$0xff] %v1313_v34 }
 0x474 PF: > { %p1504_p1 = scmp.ne.s32.totalorder %s1854_s20, 1 }
 0x476   : > { %1327 = sbr.rel (%p1504_p1) target bundleno = 1149 (0x47d), region = 52 }
 0x47b   : > { %v1328_v37 = vld [vmem:[#allocation2] sm:$0xff]  ;;  %v1329_v51 = vld [vmem:[#allocation2 + $0x8] sm:$0xff] }
 0x47c   : > { %1330 = vst [vmem:[#allocation11] sm:$0xff] %v1328_v37  ;;  %1331 = vst [vmem:[#allocation11 + $0x8] sm:$0xff] %v1329_v51 }
 0x47d PF: > { %p2578_p10 = scmp.eq.s32.totalorder %s1433_s0, 1  ;;  %s1871_s30 = smov [#allocation11]  }
 0x47e   : > { %s1341_s7 = sshll.u32 %s1871_s30, 4  ;;  %s1342_s7 = int_to_ptr.vmem [resolvable:$true] %s1341_s7 }
 0x47f   : > { %s1780_s8 = scalar_lea.vmem %s1342_s7, 256  ;;  %p1787_p13 = scmp.lt.s32.totalorder %s1342_s7, %s1342_s7 }
 0x480   : > { %p1781_p11 = scmp.ne.s32.totalorder %s1342_s7, %s1780_s8  ;;  %p1788_p0 = scmp.lt.s32.totalorder %s1780_s8, %s1780_s8 }
 0x482   : > { %p1782_p7 = pnand %p1781_p11, %p2578_p10  ;;  %p1789_p2 = por %p1788_p0, %p1787_p13 }
 0x484   : > { %p1783_p12 = pneg %p1782_p7 }
 0x486   : > { %p1790_p3 = pnand %p1789_p2, %p1783_p12 }
 0x488   : > { %1793 = shalt.err (!%p1790_p3)
}
 0x489   : > { %s1872_s20 = smov 128   ;;  %s1873_s0 = smov 8  }
 0x48a   : > { %1518 = dma.vmem_to_hbm [thread:$0]  (%p2578_p10), %s1342_s7, 256, %s2615_s4, [#allocation8], %s1872_s20, %s1872_s20, %s1873_s0  }
 0x48b   : > { %1837 = dma.done.wait (%p2578_p10), [#allocation8], 256  }
 0x48c   : > { %1839 = vsyncadd (%p2578_p10), [#allocation8], 4294967040 }
 0x48d PF: > { %s20_s22 = sadd.s32 1, %s1862_s22   ;;  %s2773_s17 = smov %s1846_s18 }
 0x48e   : > { %p17_p6 = scmp.ge.s32.totalorder %s20_s22, 4   ;;  %s2774_s18 = smov %s1850_s19 }
 0x48f   : > { %s2775_s19 = smov %s1981_s14  ;;  %s2776_s20 = smov %s1858_s21 }
 0x490   : > { %s2777_s21 = smov %s2779_s29  ;;  %19 = sbr.rel (!%p17_p6) target bundleno = 8 (0x8), region = 92 }
 0x495   :  { %1357 = vsyncpa [#allocation7], 1 }
 0x496   :  { %1359 = vsyncpa [#allocation7 + $0x1], 1 }
 0x497   :  { %1360 = vsyncpa [#allocation10], 1 }
 0x498   :  { %1361 = vsyncpa [#allocation8], 1 }
 0x499   :  { %1363 = vsyncpa [#allocation8 + $0x1], 1 }

</bundles_post_ra>
